<compile_context>
chip_gen: v7x
topology: tpu7x:2x2x1
jax: 0.10.0
libtpu: 0.0.40
codegen_flags: <defaults>
</compile_context>

<pallas_src>
import functools

import numpy as np
import jax
import jax.numpy as jnp
from jax import lax
from jax.experimental import pallas as pl
from jax.experimental.pallas import tpu as pltpu


def _round_up(n, m):
    return ((n + m - 1) // m) * m


def _sublane_multiple(dtype):
    # Row (sublane) granularity of a block: 8 for 4-byte dtypes, 16 for bf16, 32 for 1B.
    return max(8, 32 // jnp.dtype(dtype).itemsize)


def _num_tensorcores_per_device():
    """Best-effort TensorCore count per device; conservative fallback is 1 (no split)."""
    try:
        d = jax.devices()[0]
        n = getattr(d, "num_cores", None)
        if n:
            return int(n)
        kind = str(getattr(d, "device_kind", "")).lower()
        if "v7" in kind or "7x" in kind:
            return 2
    except Exception:
        pass
    return 1


def _random_projector_kernel(x_ref, wt_ref, o_ref, *, precision):
    # MXU matmul: (tm, D_in) @ (D_in, D_out) -> (tm, D_out), f32 accumulation.
    y = jnp.dot(x_ref[...], wt_ref[...],
                preferred_element_type=jnp.float32, precision=precision)
    # F.normalize(p=2, dim=1): y / max(||y||, 1e-12) == y * rsqrt(max(||y||^2, 1e-24)).
    # rsqrt issues on the EUP slot, the lane reduction on the XLU — both have slack.
    sq = jnp.sum(y * y, axis=-1, keepdims=True)
    o_ref[...] = (y * lax.rsqrt(jnp.maximum(sq, 1e-24))).astype(o_ref.dtype)


def make_weight(input_dim=768, output_dim=128, seed=42):
    # Deterministic init matching the PyTorch module's __init__.
    rng = np.random.default_rng(seed)
    W = rng.normal(0, 1, size=(output_dim, input_dim)) / np.sqrt(output_dim)
    return jnp.asarray(W, dtype=jnp.float32)


def prepare_weight(w, dtype=jnp.float32):
    """Pre-transpose the (D_out, D_in) PyTorch Linear weight to (D_in, D_out) once,
    in the dtype the kernel will consume (cast here, NOT per call)."""
    return jnp.asarray(w).astype(dtype).T


def _weight_block_spec(d_in, d_out):
    # Constant block index -> Pallas skips the weight re-DMA after step 0; Buffered(1)
    # additionally drops the idle second weight buffer (~D_in*D_out*itemsize bytes).
    try:
        return pl.BlockSpec((d_in, d_out), lambda i: (0, 0),
                            pipeline_mode=pl.Buffered(1))
    except (TypeError, AttributeError):
        # Older JAX without pipeline_mode on BlockSpec: resident weight still works.
        return pl.BlockSpec((d_in, d_out), lambda i: (0, 0))


def random_projector_forward(x, wt, *, tm=2048, out_dtype=jnp.float32, precision=None):
    """x: (B, D_in);  wt: (D_in, D_out) float — see prepare_weight().

    The kernel is HBM-streaming bound on x on v5e/v6e/v7x; all tuning here is
    tile-size / wrapper-traffic, not in-kernel compute.
    """
    B, D_in = x.shape
    D_in_w, D_out = wt.shape
    assert D_in == D_in_w
    if wt.dtype != x.dtype:            # weight is tiny; casting it per call is negligible
        wt = wt.astype(x.dtype)

    # f32 inputs: full-precision MXU path for parity with the f32 PyTorch reference
    # (hidden under the HBM stream on v6e/v7x). bf16 inputs keep the default pass.
    if precision is None and x.dtype == jnp.float32:
        precision = lax.Precision.HIGHEST

    # ---- row-tile selection --------------------------------------------------------
    sub = _sublane_multiple(x.dtype)            # 8 (f32) / 16 (bf16) row granularity
    tm = max(sub, (tm // sub) * sub)
    tm = min(tm, _round_up(B, sub))             # don't allocate tiles far bigger than B

    # Split a would-be single-step grid only on chips with >=2 TensorCores (v7x) so
    # dimension_semantics=("parallel",) can shard rows across cores. On 1-TC chips
    # (v5e/v6e) the grid is a serial loop and the split only adds per-step overhead.
    if _num_tensorcores_per_device() >= 2 and pl.cdiv(B, tm) < 2 and B >= 2 * sub:
        tm = _round_up(pl.cdiv(_round_up(B, sub), 2), sub)

    grid_n = pl.cdiv(B, tm)     # partial last block handled by Pallas (masked stores)

    kernel = functools.partial(_random_projector_kernel, precision=precision)

    return pl.pallas_call(
        kernel,
        out_shape=jax.ShapeDtypeStruct((B, D_out), out_dtype),
        grid_spec=pltpu.PrefetchScalarGridSpec(
            num_scalar_prefetch=0,
            grid=(grid_n,),
            in_specs=[
                pl.BlockSpec((tm, D_in), lambda i: (i, 0)),
                _weight_block_spec(D_in, D_out),
            ],
            out_specs=pl.BlockSpec((tm, D_out), lambda i: (i, 0)),
        ),
        compiler_params=pltpu.CompilerParams(
            dimension_semantics=("parallel",),
            # tm=2048 f32 uses ~15 MiB of VMEM; a 32 MiB scoped limit is safe on
            # v5e/v6e/v7x. Only pushing tm toward 4096 would need a generation-aware
            # (~48 MiB on v7x) limit.
            vmem_limit_bytes=32 * 1024 * 1024,
        ),
    )(x, wt)


if __name__ == "__main__":
    input_dim, output_dim = 768, 128

    w = make_weight(input_dim, output_dim, seed=42)
    wt = prepare_weight(w)

    def ref_forward(x):
        y = x @ w.T
        n = jnp.sqrt(jnp.sum(y * y, axis=1, keepdims=True))
        return y / jnp.maximum(n, 1e-12)

    key = jax.random.PRNGKey(0)
    k1, k2, k3 = jax.random.split(key, 3)

    # (batch, tm override) — exercises: exact single tile; a partial block (B % 8 != 0,
    # no wrapper padding); and a multi-step grid with a partial trailing block.
    cases = [
        (8, None, k1),
        (20, None, k2),
        (200, 64, k3),
    ]

    for batch, tm_override, k in cases:
        x = jax.random.normal(k, (batch, input_dim), dtype=jnp.float32)
        kwargs = {} if tm_override is None else {"tm": tm_override}
        out = jax.block_until_ready(random_projector_forward(x, wt, **kwargs))
        ref = jax.block_until_ready(ref_forward(x))
        np.testing.assert_allclose(
            np.asarray(out), np.asarray(ref), rtol=1e-5, atol=1e-5
        )

    print("KERNEL_OK")
</pallas_src>

<mosaic_0001>
module attributes {stable_mosaic.version = 11 : i64} {
  func.func @_random_projector_kernel(%arg0: i32, %arg1: memref<8x768xf32, #tpu.memory_space<vmem>>, %arg2: memref<768x128xf32, #tpu.memory_space<vmem>>, %arg3: memref<8x128xf32, #tpu.memory_space<vmem>>) attributes {dimension_semantics = [#tpu.dimension_semantics<parallel>], iteration_bounds = array<i64: 1>, scalar_prefetch = 0 : i64, scratch_operands = 0 : i64, tpu.core_type = #tpu.core_type<tc>, window_params = [{transform_indices = @transform_0, window_bounds = array<i64: 8, 768>}, {pipeline_mode = #tpu.pipeline_mode<synchronous>, transform_indices = @transform_1, window_bounds = array<i64: 768, 128>}, {transform_indices = @transform_2, window_bounds = array<i64: 8, 128>}]} {
    %c0 = arith.constant 0 : index
    %c0_0 = arith.constant 0 : index
    %0 = vector.load %arg1[%c0, %c0_0] : memref<8x768xf32, #tpu.memory_space<vmem>>, vector<8x768xf32>
    %c0_1 = arith.constant 0 : index
    %c0_2 = arith.constant 0 : index
    %1 = vector.load %arg2[%c0_1, %c0_2] : memref<768x128xf32, #tpu.memory_space<vmem>>, vector<768x128xf32>
    %cst = arith.constant dense<0.000000e+00> : vector<8x128xf32>
    %2 = tpu.matmul %0, %1, %cst {dimension_numbers = #tpu.dot_dimension_numbers<[1], [0], [0], [1], [0, 0, 1, 1], [], []>, precision = #tpu.contract_precision<fp32>} : vector<8x768xf32>, vector<768x128xf32>, vector<8x128xf32> -> vector<8x128xf32>
    %3 = arith.mulf %2, %2 : vector<8x128xf32>
    %cst_3 = arith.constant dense<0.000000e+00> : vector<8xf32>
    %4 = vector.multi_reduction <add>, %3, %cst_3 [1] : vector<8x128xf32> to vector<8xf32>
    %5 = vector.shape_cast %4 : vector<8xf32> to vector<8x1xf32>
    %cst_4 = arith.constant 1.000000e-24 : f32
    %6 = vector.broadcast %cst_4 : f32 to vector<8x1xf32>
    %7 = arith.maximumf %5, %6 : vector<8x1xf32>
    %8 = math.rsqrt %7 : vector<8x1xf32>
    %9 = vector.broadcast %8 : vector<8x1xf32> to vector<8x128xf32>
    %10 = arith.mulf %2, %9 : vector<8x128xf32>
    %c0_5 = arith.constant 0 : index
    %c0_6 = arith.constant 0 : index
    %11 = vector.load %arg3[%c0_5, %c0_6] : memref<8x128xf32, #tpu.memory_space<vmem>>, vector<8x128xf32>
    tpu.vector_store %arg3[%c0_5, %c0_6], %10 {strides = array<i32>} : memref<8x128xf32, #tpu.memory_space<vmem>>, vector<8x128xf32>,
    return
  }
  func.func @transform_0(%arg0: i32) -> (i32, i32) {
    %c0_i32 = arith.constant 0 : i32
    %c0_i32_0 = arith.constant 0 : i32
    return %arg0, %c0_i32 : i32, i32
  }
  func.func @transform_1(%arg0: i32) -> (i32, i32) {
    %c0_i32 = arith.constant 0 : i32
    %c0_i32_0 = arith.constant 0 : i32
    %c0_i32_1 = arith.constant 0 : i32
    return %c0_i32, %c0_i32_0 : i32, i32
  }
  func.func @transform_2(%arg0: i32) -> (i32, i32) {
    %c0_i32 = arith.constant 0 : i32
    %c0_i32_0 = arith.constant 0 : i32
    return %arg0, %c0_i32 : i32, i32
  }
}

</mosaic_0001>

<bundles_post_ra>
// kernel: tpu_custom_call.1
= control target key start
LH: loop header
LB: loop body
LE: loop exit
PB: predicated region body
PF: predicated region fallthrough
CT: control target
= control target key end

     0   :  { %7 = vsyncpa [#allocation3], 0  ;;  %s5421_s0 = inlined_call_operand.hbm [shape: f32[8,768], index: 0, kind: input, shape index: {}]   ;;  %s5422_s1 = inlined_call_operand.hbm [shape: f32[768,128], index: 1, kind: input, shape index: {}]   ;;  %s5423_s2 = inlined_call_operand.hbm [shape: f32[8,128], index: 2, kind: output, shape index: {}]  }
   0x1   :  { %8 = vsyncpa [#allocation6], 0 }
   0x2   :  { %9 = vsyncpa [#allocation4], 0  ;;  %s4034_s9 = smov [#allocation2]   ;;  %s4035_s11 = smov [#allocation5]  }
   0x3   :  { %s16_s10 = sshll.u32 %s4034_s9, 4  ;;  %s25_s12 = sshll.u32 %s4035_s11, 4  ;;  %s17_s10 = int_to_ptr.vmem [resolvable:$true] %s16_s10  ;;  %s4054_s12 = int_to_ptr.vmem [resolvable:$true] %s25_s12 }
   0x4   :  { %s3962_s15 = scalar_lea.hbm %s5421_s0, 768 }
   0x5   :  { %p3963_p0 = scmp.ne.s32.totalorder %s5421_s0, %s3962_s15  ;;  %p3966_p1 = scmp.lt.u32.totalorder %s3962_s15, %s5421_s0 }
   0x7   :  { %p3968_p2 = pnand %p3966_p1, %p3963_p0 }
   0x9   :  { %3971 = shalt.err (!%p3968_p2)
}
   0xa   :  { %s3972_s20 = scalar_lea.vmem %s17_s10, 768  ;;  %p3977_p4 = scmp.lt.s32.totalorder %s17_s10, %s17_s10 }
   0xb   :  { %p3973_p3 = scmp.ne.s32.totalorder %s17_s10, %s3972_s20  ;;  %p3978_p5 = scmp.lt.s32.totalorder %s3972_s20, %s3972_s20 }
   0xd   :  { %p3979_p6 = por %p3978_p5, %p3977_p4 }
   0xf   :  { %p3980_p7 = pnand %p3979_p6, %p3973_p3 }
  0x11   :  { %3983 = shalt.err (!%p3980_p7)
}
  0x12   :  { %19 = dma.hbm_to_vmem [thread:$0]  %s5421_s0, 768, %s17_s10, [#allocation3]  }
  0x13   :  { %s3984_s25 = scalar_lea.hbm %s5422_s1, 12288 }
  0x14   :  { %p3985_p8 = scmp.ne.s32.totalorder %s5422_s1, %s3984_s25  ;;  %p3988_p9 = scmp.lt.u32.totalorder %s3984_s25, %s5422_s1 }
  0x16   :  { %p3990_p10 = pnand %p3988_p9, %p3985_p8 }
  0x18   :  { %3993 = shalt.err (!%p3990_p10)
}
  0x19   :  { %s3994_s30 = scalar_lea.vmem %s4054_s12, 12288  ;;  %p3999_p12 = scmp.lt.s32.totalorder %s4054_s12, %s4054_s12 }
  0x1a   :  { %p3995_p11 = scmp.ne.s32.totalorder %s4054_s12, %s3994_s30  ;;  %p4000_p13 = scmp.lt.s32.totalorder %s3994_s30, %s3994_s30 }
  0x1c   :  { %p4001_p0 = por %p4000_p13, %p3999_p12 }
  0x1e   :  { %p4002_p1 = pnand %p4001_p0, %p3995_p11 }
  0x20   :  { %4005 = shalt.err (!%p4002_p1)
}
  0x21   :  { %s4036_s0 = smov 128   ;;  %s4037_s3 = smov 8  }
  0x22   :  { %31 = dma.hbm_to_vmem [thread:$0]  %s5422_s1, 12288, %s4054_s12, [#allocation6], %s4036_s0, %s4036_s0, %s4037_s3  }
  0x23   :  { %4028 = dma.done.wait [#allocation3], 768  }
  0x24   :  { %4029 = vsyncadd [#allocation3], 4294966528 }
  0x25   :  { %4030 = dma.done.wait [#allocation6], 12288  }
  0x26   :  { %4031 = vsyncadd [#allocation6], 4294955008  ;;  %v60_v0 = vld [vmem:[#allocation5 + $0x80] sm:$0xff]  ;;  %v61_v1 = vld [vmem:[#allocation5 + $0x88] sm:$0xff]  ;;  %s4038_s1 = smov [#allocation7]  }
  0x27   :  { %v44_v2 = vld [vmem:[#allocation5] sm:$0xff]  ;;  %v189_v3 = vand.u32 4294901760, %v60_v0  ;;  %v192_v4 = vand.u32 4294901760, %v61_v1  ;;  %v45_v5 = vld [vmem:[#allocation5 + $0x8] sm:$0xff]  ;;  %v62_v7 = vld [vmem:[#allocation5 + $0x90] sm:$0xff]  ;;  %s2739_s6 = sshll.u32 %s4038_s1, 4  ;;  %s2740_s6 = int_to_ptr.vmem [resolvable:$true] %s2739_s6 }
  0x28   :  { %v141_v6 = vand.u32 4294901760, %v44_v2  ;;  %v63_v8 = vld [vmem:[#allocation5 + $0x98] sm:$0xff]  ;;  %v144_v9 = vand.u32 4294901760, %v45_v5  ;;  %v195_v10 = vand.u32 4294901760, %v62_v7  ;;  %v46_v12 = vld [vmem:[#allocation5 + $0x10] sm:$0xff]  ;;  %v64_v18 = vld [vmem:[#allocation5 + $0xa0] sm:$0xff]  ;;  %p4011_p3 = scmp.lt.s32.totalorder %s2740_s6, %s2740_s6 }
  0x29   :  { %v198_v11 = vand.u32 4294901760, %v63_v8  ;;  %v47_v13 = vld [vmem:[#allocation5 + $0x18] sm:$0xff]  ;;  %v4085_v14 = vpack.c.bf16 %v192_v4, %v189_v3  ;;  %v147_v16 = vand.u32 4294901760, %v46_v12  ;;  %v65_v19 = vld [vmem:[#allocation5 + $0xa8] sm:$0xff]  ;;  %v48_v23 = vld [vmem:[#allocation5 + $0x20] sm:$0xff]  ;;  %v201_v29 = vand.u32 4294901760, %v64_v18 }
  0x2a   :  { %v4087_v15 = vsub.f32 %v44_v2, %v141_v6  ;;  %v150_v17 = vand.u32 4294901760, %v47_v13  ;;  %v4089_v20 = vpack.c.bf16 %v144_v9, %v141_v6  ;;  %v4091_v21 = vsub.f32 %v45_v5, %v144_v9  ;;  %v49_v24 = vld [vmem:[#allocation5 + $0x28] sm:$0xff]  ;;  %v66_v37 = vld [vmem:[#allocation5 + $0xb0] sm:$0xff]  ;;  %v67_v42 = vld [vmem:[#allocation5 + $0xb8] sm:$0xff]  ;;  %s4006_s7 = scalar_lea.vmem %s2740_s6, 128 }
  0x2b   :  { %v4093_v22 = vpack.c.bf16 %v198_v11, %v195_v10  ;;  %3380 = vmatprep.subr.bf16.mxu0 %v4085_v14  ;;  %v4096_v25 = vsub.f32 %v62_v7, %v195_v10  ;;  %v4098_v26 = vsub.f32 %v63_v8, %v198_v11  ;;  %v4102_v28 = vsub.f32 %v46_v12, %v147_v16  ;;  %v50_v55 = vld [vmem:[#allocation5 + $0x30] sm:$0xff]  ;;  %v51_v56 = vld [vmem:[#allocation5 + $0x38] sm:$0xff]  ;;  %v68_v5 = vld [vmem:[#allocation5 + $0xc0] sm:$0xff]  ;;  %p4007_p2 = scmp.ne.s32.totalorder %s2740_s6, %s4006_s7  ;;  %p4012_p4 = scmp.lt.s32.totalorder %s4006_s7, %s4006_s7 }
  0x2c   :  { %v4100_v27 = vpack.c.bf16 %v150_v17, %v147_v16  ;;  %3382 = vmatpush3.bf16.msra.mxu0 %v4089_v20  ;;  %v204_v30 = vand.u32 4294901760, %v65_v19  ;;  %v4105_v31 = vsub.f32 %v60_v0, %v189_v3  ;;  %v4107_v32 = vsub.f32 %v61_v1, %v192_v4  ;;  %v69_v6 = vld [vmem:[#allocation5 + $0xc8] sm:$0xff]  ;;  %v52_v11 = vld [vmem:[#allocation5 + $0x40] sm:$0xff] }
  0x2d   :  { %3384 = vmatprep.subr.bf16.mxu0 %v4093_v22  ;;  %v153_v33 = vand.u32 4294901760, %v48_v23  ;;  %v156_v34 = vand.u32 4294901760, %v49_v24  ;;  %v5439_v35 = vand.u32 4294901760, %v4087_v15  ;;  %v5438_v36 = vand.u32 4294901760, %v4091_v21  ;;  %p4013_p5 = por %p4012_p4, %p4011_p3 }
  0x2e   :  { %v4112_v38 = vsub.f32 %v47_v13, %v150_v17  ;;  %v4114_v39 = vpack.c.bf16 %v204_v30, %v201_v29  ;;  %v4116_v40 = vsub.f32 %v64_v18, %v201_v29  ;;  %v5443_v41 = vand.u32 4294901760, %v4105_v31  ;;  %v53_v29 = vld [vmem:[#allocation5 + $0x48] sm:$0xff] }
  0x2f   :  { %v4119_v43 = vsub.f32 %v65_v19, %v204_v30  ;;  %v5441_v44 = vand.u32 4294901760, %v4107_v32  ;;  %v4122_v45 = vpack.c.bf16 %v156_v34, %v153_v33  ;;  %v4124_v46 = vsub.f32 %v48_v23, %v153_v33  ;;  %p4014_p6 = pnand %p4013_p5, %p4007_p2 }
  0x30   :  { %3386 = vmatpush3.bf16.msra.mxu0 %v4100_v27  ;;  %v368_v47 = vsub.f32 %v4105_v31, %v5443_v41  ;;  %v256_v48 = vsub.f32 %v4087_v15, %v5439_v35  ;;  %v263_v49 = vsub.f32 %v4091_v21, %v5438_v36  ;;  %v207_v50 = vand.u32 4294901760, %v66_v37  ;;  %v39_v41 = vld [vmem:[#allocation2 + $0x8] sm:$0xff] }
  0x31   :  { %3388 = vmatprep.subr.bf16.mxu0 %v4114_v39  ;;  %v375_v51 = vsub.f32 %v4107_v32, %v5441_v44  ;;  %v210_v52 = vand.u32 4294901760, %v67_v42  ;;  %v5436_v53 = vand.u32 4294901760, %v4096_v25  ;;  %v5434_v54 = vand.u32 4294901760, %v4098_v26 }
  0x32   :  { %v369_v57 = vand.u32 4294901760, %v368_v47  ;;  %v4142_v58 = vsub.f32 %v49_v24, %v156_v34  ;;  %v257_v59 = vand.u32 4294901760, %v256_v48  ;;  %v264_v60 = vand.u32 4294901760, %v263_v49 }
  0x33   :  { %v376_v61 = vand.u32 4294901760, %v375_v51  ;;  %v4144_v62 = vpack.c.bf16 %v210_v52, %v207_v50  ;;  %v4146_v63 = vsub.f32 %v66_v37, %v207_v50  ;;  %v382_v0 = vsub.f32 %v4096_v25, %v5436_v53 }
  0x34   :  { %3390 = vmatpush3.bf16.msra.mxu0 %v4122_v45  ;;  %v3413_v1 = vpack.c.bf16 %v264_v60, %v257_v59  ;;  %v389_v2 = vsub.f32 %v4098_v26, %v5434_v54  ;;  %v159_v3 = vand.u32 4294901760, %v50_v55  ;;  %v162_v4 = vand.u32 4294901760, %v51_v56  ;;  %v71_v59 = vld [vmem:[#allocation5 + $0xd8] sm:$0xff] }
  0x35   :  { %v3411_v7 = vpack.c.bf16 %v376_v61, %v369_v57  ;;  %3392 = vmatprep.subr.bf16.mxu0 %v4144_v62  ;;  %v383_v8 = vand.u32 4294901760, %v382_v0  ;;  %v5433_v9 = vand.u32 4294901760, %v4102_v28  ;;  %v5431_v10 = vand.u32 4294901760, %v4112_v38  ;;  %v70_v57 = vld [vmem:[#allocation5 + $0xd0] sm:$0xff]  ;;  %v75_v54 = vld [vmem:[#allocation5 + $0xf8] sm:$0xff] }
  0x36   :  { %v4158_v12 = vsub.f32 %v67_v42, %v210_v52  ;;  %v390_v13 = vand.u32 4294901760, %v389_v2  ;;  %v4160_v16 = vpack.c.bf16 %v162_v4, %v159_v3  ;;  %v4162_v17 = vsub.f32 %v50_v55, %v159_v3 }
  0x37   :  { %3412 = vmatprep.subr.bf16.mxu1 %v3411_v7  ;;  %v270_v18 = vsub.f32 %v4102_v28, %v5433_v9  ;;  %v277_v19 = vsub.f32 %v4112_v38, %v5431_v10  ;;  %v213_v23 = vand.u32 4294901760, %v68_v5  ;;  %v216_v24 = vand.u32 4294901760, %v69_v6  ;;  %v74_v9 = vld [vmem:[#allocation5 + $0xf0] sm:$0xff] }
  0x38   :  { %3414 = vmatpush3.bf16.msra.mxu1 %v3413_v1  ;;  %v3415_v30 = vpack.c.bf16 %v390_v13, %v383_v8  ;;  %3394 = vmatpush3.bf16.msra.mxu0 %v4160_v16  ;;  %v5429_v33 = vand.u32 4294901760, %v4116_v40  ;;  %v5428_v34 = vand.u32 4294901760, %v4119_v43  ;;  %v165_v37 = vand.u32 4294901760, %v52_v11  ;;  %v54_v1 = vld [vmem:[#allocation5 + $0x50] sm:$0xff] }
  0x39   :  { %v4173_v42 = vsub.f32 %v51_v56, %v162_v4  ;;  %v271_v47 = vand.u32 4294901760, %v270_v18  ;;  %v278_v48 = vand.u32 4294901760, %v277_v19  ;;  %v4175_v49 = vpack.c.bf16 %v216_v24, %v213_v23  ;;  %v55_v18 = vld [vmem:[#allocation5 + $0x58] sm:$0xff] }
  0x3a   :  { %3416 = vmatprep.subr.bf16.mxu1 %v3415_v30  ;;  %v4177_v50 = vsub.f32 %v68_v5, %v213_v23  ;;  %v396_v51 = vsub.f32 %v4116_v40, %v5429_v33  ;;  %v403_v52 = vsub.f32 %v4119_v43, %v5428_v34  ;;  %v168_v55 = vand.u32 4294901760, %v53_v29 }
  0x3b   :  { %v3417_v56 = vpack.c.bf16 %v278_v48, %v271_v47  ;;  %3396 = vmatprep.subr.bf16.mxu0 %v4175_v49  ;;  %v4186_v60 = vsub.f32 %v69_v6, %v216_v24  ;;  %v5426_v61 = vand.u32 4294901760, %v4124_v46  ;;  %v5424_v0 = vand.u32 4294901760, %v4142_v58 }
  0x3c   :  { %v397_v2 = vand.u32 4294901760, %v396_v51  ;;  %v404_v3 = vand.u32 4294901760, %v403_v52  ;;  %v4190_v4 = vpack.c.bf16 %v168_v55, %v165_v37  ;;  %v4192_v5 = vsub.f32 %v52_v11, %v165_v37 }
  0x3d   :  { %3418 = vmatpush3.bf16.msra.mxu1 %v3417_v56  ;;  %v284_v7 = vsub.f32 %v4124_v46, %v5426_v61  ;;  %v291_v6 = vsub.f32 %v4142_v58, %v5424_v0  ;;  %v219_v8 = vand.u32 4294901760, %v70_v57  ;;  %v222_v13 = vand.u32 4294901760, %v71_v59  ;;  %v73_v0 = vld [vmem:[#allocation5 + $0xe8] sm:$0xff] }
  0x3e   :  { %v3419_v19 = vpack.c.bf16 %v404_v3, %v397_v2  ;;  %3398 = vmatpush3.bf16.msra.mxu0 %v4190_v4  ;;  %v5425_v23 = vand.u32 4294901760, %v4146_v63  ;;  %v5427_v11 = vand.u32 4294901760, %v4158_v12  ;;  %v171_v24 = vand.u32 4294901760, %v54_v1  ;;  %v72_v3 = vld [vmem:[#allocation5 + $0xe0] sm:$0xff] }
  0x3f   :  { %v4203_v30 = vsub.f32 %v53_v29, %v168_v55  ;;  %v285_v37 = vand.u32 4294901760, %v284_v7  ;;  %v292_v47 = vand.u32 4294901760, %v291_v6  ;;  %v4205_v48 = vpack.c.bf16 %v222_v13, %v219_v8  ;;  %v56_v6 = vld [vmem:[#allocation5 + $0x60] sm:$0xff] }
  0x40   :  { %3420 = vmatprep.subr.bf16.mxu1 %v3419_v19  ;;  %v4207_v51 = vsub.f32 %v70_v57, %v219_v8  ;;  %v410_v52 = vsub.f32 %v4146_v63, %v5425_v23  ;;  %v417_v56 = vsub.f32 %v4158_v12, %v5427_v11  ;;  %v174_v2 = vand.u32 4294901760, %v55_v18  ;;  %v57_v11 = vld [vmem:[#allocation5 + $0x68] sm:$0xff] }
  0x41   :  { %v3421_v29 = vpack.c.bf16 %v292_v47, %v285_v37  ;;  %3400 = vmatprep.subr.bf16.mxu0 %v4205_v48  ;;  %v4216_v55 = vsub.f32 %v71_v59, %v222_v13  ;;  %v5430_v7 = vand.u32 4294901760, %v4162_v17  ;;  %v5432_v57 = vand.u32 4294901760, %v4173_v42 }
  0x42   :  { %v411_v8 = vand.u32 4294901760, %v410_v52  ;;  %v418_v19 = vand.u32 4294901760, %v417_v56  ;;  %v4220_v23 = vpack.c.bf16 %v174_v2, %v171_v24  ;;  %v4222_v61 = vsub.f32 %v54_v1, %v171_v24 }
  0x43   :  { %3422 = vmatpush3.bf16.msra.mxu1 %v3421_v29  ;;  %v298_v37 = vsub.f32 %v4162_v17, %v5430_v7  ;;  %v305_v59 = vsub.f32 %v4173_v42, %v5432_v57  ;;  %v225_v13 = vand.u32 4294901760, %v72_v3  ;;  %v228_v47 = vand.u32 4294901760, %v73_v0 }
  0x44   :  { %5559 = vst [vmem:[#allocation11_spill] sm:$0xff] %v4220_v23  ;;  %v3423_v34 = vpack.c.bf16 %v418_v19, %v411_v8  ;;  %3402 = vmatpush3.bf16.msra.mxu0 %v4220_v23  ;;  %v5435_v52 = vand.u32 4294901760, %v4177_v50  ;;  %v5437_v1 = vand.u32 4294901760, %v4186_v60  ;;  %v177_v24 = vand.u32 4294901760, %v56_v6 }
  0x45   :  { %v4233_v56 = vsub.f32 %v55_v18, %v174_v2  ;;  %v299_v29 = vand.u32 4294901760, %v298_v37  ;;  %v306_v33 = vand.u32 4294901760, %v305_v59  ;;  %v4235_v7 = vpack.c.bf16 %v228_v47, %v225_v13  ;;  %v58_v37 = vld [vmem:[#allocation5 + $0x70] sm:$0xff] }
  0x46   :  { %3424 = vmatprep.subr.bf16.mxu1 %v3423_v34  ;;  %v4237_v10 = vsub.f32 %v72_v3, %v225_v13  ;;  %v424_v8 = vsub.f32 %v4177_v50, %v5435_v52  ;;  %v431_v19 = vsub.f32 %v4186_v60, %v5437_v1  ;;  %v180_v57 = vand.u32 4294901760, %v57_v11  ;;  %v59_v1 = vld [vmem:[#allocation5 + $0x78] sm:$0xff] }
  0x47   :  { %5560 = vst [vmem:[#allocation12_spill] sm:$0xff] %v4235_v7  ;;  %v3425_v18 = vpack.c.bf16 %v306_v33, %v299_v29  ;;  %3404 = vmatprep.subr.bf16.mxu0 %v4235_v7  ;;  %v4246_v2 = vsub.f32 %v73_v0, %v228_v47  ;;  %v5440_v34 = vand.u32 4294901760, %v4192_v5  ;;  %v5442_v3 = vand.u32 4294901760, %v4203_v30 }
  0x48   :  { %v425_v59 = vand.u32 4294901760, %v424_v8  ;;  %v432_v13 = vand.u32 4294901760, %v431_v19  ;;  %v4250_v52 = vpack.c.bf16 %v180_v57, %v177_v24  ;;  %v4252_v53 = vsub.f32 %v56_v6, %v177_v24 }
  0x49   :  { %3426 = vmatpush3.bf16.msra.mxu1 %v3425_v18  ;;  %v312_v33 = vsub.f32 %v4192_v5, %v5440_v34  ;;  %v319_v0 = vsub.f32 %v4203_v30, %v5442_v3  ;;  %v231_v47 = vand.u32 4294901760, %v74_v9  ;;  %v234_v29 = vand.u32 4294901760, %v75_v54 }
  0x4a   :  { %5561 = vst [vmem:[#allocation13_spill] sm:$0xff] %v4250_v52  ;;  %v3427_v36 = vpack.c.bf16 %v432_v13, %v425_v59  ;;  %3406 = vmatpush3.bf16.msra.mxu0 %v4250_v52  ;;  %v5446_v8 = vand.u32 4294901760, %v4207_v51  ;;  %v5447_v6 = vand.u32 4294901760, %v4216_v55  ;;  %v183_v24 = vand.u32 4294901760, %v58_v37 }
  0x4b   :  { %v4263_v19 = vsub.f32 %v57_v11, %v180_v57  ;;  %v313_v18 = vand.u32 4294901760, %v312_v33  ;;  %v320_v35 = vand.u32 4294901760, %v319_v0  ;;  %v4265_v34 = vpack.c.bf16 %v234_v29, %v231_v47 }
  0x4c   :  { %3428 = vmatprep.subr.bf16.mxu1 %v3427_v36  ;;  %v4267_v44 = vsub.f32 %v74_v9, %v231_v47  ;;  %v438_v59 = vsub.f32 %v4207_v51, %v5446_v8  ;;  %v445_v13 = vsub.f32 %v4216_v55, %v5447_v6  ;;  %v186_v3 = vand.u32 4294901760, %v59_v1  ;;  %v38_v9 = vld [vmem:[#allocation2] sm:$0xff] }
  0x4d   :  { %5562 = vst [vmem:[#allocation14_spill] sm:$0xff] %v4265_v34  ;;  %v3429_v52 = vpack.c.bf16 %v320_v35, %v313_v18  ;;  %3408 = vmatprep.subr.bf16.mxu0 %v4265_v34  ;;  %v4276_v11 = vsub.f32 %v75_v54, %v234_v29  ;;  %v5448_v57 = vand.u32 4294901760, %v4222_v61  ;;  %v5449_v36 = vand.u32 4294901760, %v4233_v56 }
  0x4e   :  { %v439_v33 = vand.u32 4294901760, %v438_v59  ;;  %v446_v0 = vand.u32 4294901760, %v445_v13  ;;  %v4280_v47 = vpack.c.bf16 %v186_v3, %v183_v24  ;;  %v4282_v8 = vsub.f32 %v58_v37, %v183_v24 }
  0x4f   :  { %3430 = vmatpush3.bf16.msra.mxu1 %v3429_v52  ;;  %v326_v35 = vsub.f32 %v4222_v61, %v5448_v57  ;;  %v333_v54 = vsub.f32 %v4233_v56, %v5449_v36  ;;  %v4290_v29 = vand.u32 4294901760, %v39_v41  ;;  %v5452_v18 = vand.u32 4294901760, %v4237_v10 }
  0x50   :  { %5563 = vst [vmem:[#allocation15_spill] sm:$0xff] %v4280_v47  ;;  %v3431_v6 = vpack.c.bf16 %v446_v0, %v439_v33  ;;  %3410 = vmatpush3.bf16.msra.mxu0 %v4280_v47  ;;  %v5458_v59 = vand.u32 4294901760, %v4246_v2  ;;  %v3443_v52 = vpack.c.bf16 %v4107_v32, %v4105_v31  ;;  %v4297_v37 = vand.u32 4294901760, %v38_v9 }
  0x51   :  { %5564 = vst [vmem:[#allocation16_spill] sm:$0xff] %v4290_v29  ;;  %v327_v24 = vand.u32 4294901760, %v326_v35  ;;  %v334_v13 = vand.u32 4294901760, %v333_v54  ;;  %v4300_v57 = vsub.f32 %v39_v41, %v4290_v29  ;;  %v452_v36 = vsub.f32 %v4237_v10, %v5452_v18  ;;  %477 = vmatprep.mubr.f32.mxu1 %v4290_v29 }
  0x52   :  { %3432 = vmatprep.subr.bf16.mxu1 %v3431_v6  ;;  %v459_v33 = vsub.f32 %v4246_v2, %v5458_v59  ;;  %3444 = vmatprep.subr.bf16.mxu0 %v3443_v52  ;;  %v4310_v0 = vsub.f32 %v38_v9, %v4297_v37  ;;  %v5457_v35 = vand.u32 4294901760, %v4252_v53  ;;  %v5459_v41 = vand.u32 4294901760, %v4263_v19 }
  0x53   :  { %v4314_v54 = vsub.f32 %v59_v1, %v186_v3  ;;  %v3433_v47 = vpack.c.bf16 %v334_v13, %v327_v24  ;;  %v5460_v18 = vand.u32 4294901760, %v4300_v57  ;;  %v453_v34 = vand.u32 4294901760, %v452_v36 }
  0x54   :  { %v460_v29 = vand.u32 4294901760, %v459_v33  ;;  %v244_v6 = vand.u32 4294901760, %v4310_v0  ;;  %v340_v52 = vsub.f32 %v4252_v53, %v5457_v35  ;;  %v347_v9 = vsub.f32 %v4263_v19, %v5459_v41 }
  0x55   :  { %3434 = vmatpush3.bf16.msra.mxu1 %v3433_v47  ;;  %v239_v1 = vsub.f32 %v4300_v57, %v5460_v18  ;;  %v3445_v3 = vpack.c.bf16 %v4091_v21, %v4087_v15  ;;  %v5465_v36 = vand.u32 4294901760, %v4267_v44  ;;  %v5468_v24 = vand.u32 4294901760, %v4276_v11 }
  0x56   :  { %v3435_v13 = vpack.c.bf16 %v460_v29, %v453_v34  ;;  %v245_v33 = vsub.f32 %v4310_v0, %v244_v6  ;;  %v341_v35 = vand.u32 4294901760, %v340_v52  ;;  %v348_v59 = vand.u32 4294901760, %v347_v9 }
  0x57   :  { %v240_v41 = vand.u32 4294901760, %v239_v1  ;;  %v466_v47 = vsub.f32 %v4267_v44, %v5465_v36  ;;  %v473_v18 = vsub.f32 %v4276_v11, %v5468_v24  ;;  %v5467_v7 = vand.u32 4294901760, %v4282_v8 }
  0x58   :  { %3436 = vmatprep.subr.bf16.mxu1 %v3435_v13  ;;  %v246_v23 = vand.u32 4294901760, %v245_v33  ;;  %v3437_v34 = vpack.c.bf16 %v348_v59, %v341_v35  ;;  %v3447_v29 = vpack.c.bf16 %v4098_v26, %v4096_v25  ;;  %v5466_v52 = vand.u32 4294901760, %v4314_v54 }
  0x59   :  { %241 = vmatprep.mubr.f32.mxu0 %v240_v41  ;;  %v467_v9 = vand.u32 4294901760, %v466_v47  ;;  %v474_v1 = vand.u32 4294901760, %v473_v18  ;;  %v354_v36 = vsub.f32 %v4282_v8, %v5467_v7  ;;  %v3449_v33 = vpack.c.bf16 %v4112_v38, %v4102_v28 }
  0x5a   :  { %247 = vmatmul.mubr.f32.vlgmr.msra.gmra.mrb[0].mxu0 %v246_v23  ;;  %3438 = vmatpush3.bf16.msra.mxu1 %v3437_v34  ;;  %v361_v13 = vsub.f32 %v4314_v54, %v5466_v52  ;;  %v3451_v41 = vpack.c.bf16 %v4119_v43, %v4116_v40  ;;  %v3453_v23 = vpack.c.bf16 %v4142_v58, %v4124_v46  ;;  %v5566_v34 = vand.u32 4294901760, %v4107_v32 }
  0x5b   :  { %3446 = vmatpush3.bf16.msra.mxu0 %v3445_v3  ;;  %v3439_v59 = vpack.c.bf16 %v474_v1, %v467_v9  ;;  %v355_v35 = vand.u32 4294901760, %v354_v36  ;;  %614 = vmatprep.mubr.f32.mxu0 %v4300_v57  ;;  %v3455_v47 = vpack.c.bf16 %v4158_v12, %v4146_v63  ;;  %v5565_v36 = vand.u32 4294901760, %v4105_v31 }
  0x5c   :  { %3448 = vmatprep.subr.bf16.mxu0 %v3447_v29  ;;  %v362_v18 = vand.u32 4294901760, %v361_v13  ;;  %v5567_v1 = vand.u32 4294901760, %v4087_v15  ;;  %v5568_v29 = vand.u32 4294901760, %v4091_v21  ;;  %v5569_v52 = vand.u32 4294901760, %v4096_v25 }
  0x5d   :  { %3440 = vmatprep.subr.bf16.mxu1 %v3439_v59  ;;  %v3507_v9 = vpack.c.bf16 %v5566_v34, %v5565_v36  ;;  %v5570_v59 = vand.u32 4294901760, %v4098_v26  ;;  %v5571_v24 = vand.u32 4294901760, %v4102_v28  ;;  %v5573_v31 = vand.u32 4294901760, %v4116_v40 }
  0x5e   :  { %v3441_v3 = vpack.c.bf16 %v362_v18, %v355_v35  ;;  %v3509_v13 = vpack.c.bf16 %v5568_v29, %v5567_v1  ;;  %v5572_v35 = vand.u32 4294901760, %v4112_v38  ;;  %v5574_v32 = vand.u32 4294901760, %v4119_v43  ;;  %v5588_v29 = vld [vmem:[#allocation16_spill] sm:$0xff] }
  0x5f   :  { %v3511_v7 = vpack.c.bf16 %v5570_v59, %v5569_v52  ;;  %3450 = vmatpush3.bf16.msra.mxu0 %v3449_v33  ;;  %v5575_v15 = vand.u32 4294901760, %v4124_v46  ;;  %v5576_v21 = vand.u32 4294901760, %v4142_v58  ;;  %v5577_v25 = vand.u32 4294901760, %v4146_v63  ;;  %v93_v59 = vld [vmem:[#allocation5 + $0x188] sm:$0xff] }
  0x60   :  { %v3513_v18 = vpack.c.bf16 %v5572_v35, %v5571_v24  ;;  %v3515_v36 = vpack.c.bf16 %v5574_v32, %v5573_v31  ;;  %v5578_v26 = vand.u32 4294901760, %v4158_v12  ;;  %3442 = vmatpush3.bf16.msra.mxu1 %v3441_v3  ;;  %3452 = vmatprep.subr.bf16.mxu0 %v3451_v41  ;;  %v5579_v28 = vand.u32 4294901760, %v4162_v17  ;;  %v76_v35 = vld [vmem:[#allocation5 + $0x100] sm:$0xff]  ;;  %v77_v31 = vld [vmem:[#allocation5 + $0x108] sm:$0xff]  ;;  %v5589_v32 = vld [vmem:[#allocation13_spill] sm:$0xff] }
  0x61   :  { %v4383_v34 = vpack.c.bf16 %v5576_v21, %v5575_v15  ;;  %v5580_v38 = vand.u32 4294901760, %v4173_v42  ;;  %v5581_v43 = vand.u32 4294901760, %v4177_v50  ;;  %v5582_v46 = vand.u32 4294901760, %v4186_v60  ;;  %3476 = vmatprep.subr.bf16.mxu1 %v4085_v14  ;;  %v5590_v15 = vld [vmem:[#allocation14_spill] sm:$0xff] }
  0x62   :  { %v4389_v52 = vpack.c.bf16 %v5578_v26, %v5577_v25  ;;  %v5583_v63 = vand.u32 4294901760, %v4192_v5  ;;  %v5584_v12 = vand.u32 4294901760, %v4203_v30  ;;  %v3457_v33 = vpack.c.bf16 %v4173_v42, %v4162_v17 }
  0x63   :  { %v4395_v40 = vpack.c.bf16 %v5580_v38, %v5579_v28  ;;  %v4401_v58 = vpack.c.bf16 %v5582_v46, %v5581_v43  ;;  %479 = vmatmul.mubr.f32.vlgmr.msra.gmra.mrb[0].mxu1 %v4297_v37  ;;  %3454 = vmatpush3.bf16.msra.mxu0 %v3453_v23  ;;  %v3459_v41 = vpack.c.bf16 %v4186_v60, %v4177_v50  ;;  %v5585_v3 = vand.u32 4294901760, %v4300_v57  ;;  %v5586_v57 = vld [vmem:[#allocation11_spill] sm:$0xff]  ;;  %v5587_v23 = vld [vmem:[#allocation12_spill] sm:$0xff] }
  0x64   :  { %v4407_v24 = vpack.c.bf16 %v5584_v12, %v5583_v63  ;;  %3478 = vmatpush3.bf16.msra.mxu1 %v4089_v20  ;;  %3456 = vmatprep.subr.bf16.mxu0 %v3455_v47  ;;  %v3461_v1 = vpack.c.bf16 %v4203_v30, %v4192_v5  ;;  %v3463_v17 = vpack.c.bf16 %v4216_v55, %v4207_v51  ;;  %v92_v47 = vld [vmem:[#allocation5 + $0x180] sm:$0xff]  ;;  %v1054_v25 = vand.u32 4294901760, %v93_v59  ;;  %v5591_v28 = vld [vmem:[#allocation15_spill] sm:$0xff]  ;;  %v94_v38 = vld [vmem:[#allocation5 + $0x190] sm:$0xff] }
  0x65   :  { %3480 = vmatprep.subr.bf16.mxu1 %v4093_v22  ;;  %721 = vmatprep.mubr.f32.mxu1 %v5585_v3  ;;  %v3465_v42 = vpack.c.bf16 %v4233_v56, %v4222_v61  ;;  %v3467_v50 = vpack.c.bf16 %v4246_v2, %v4237_v10  ;;  %v3469_v60 = vpack.c.bf16 %v4263_v19, %v4252_v53  ;;  %v1051_v21 = vand.u32 4294901760, %v92_v47  ;;  %v78_v46 = vld [vmem:[#allocation5 + $0x110] sm:$0xff]  ;;  %v79_v63 = vld [vmem:[#allocation5 + $0x118] sm:$0xff] }
  0x66   :  { %v3471_v5 = vpack.c.bf16 %v4276_v11, %v4267_v44  ;;  %v3473_v30 = vpack.c.bf16 %v4314_v54, %v4282_v8  ;;  %v1003_v26 = vand.u32 4294901760, %v76_v35  ;;  %v4451_v12 = vsub.f32 %v93_v59, %v1054_v25 }
  0x67   :  { %3458 = vmatpush3.bf16.msra.mxu0 %v3457_v33  ;;  %v4449_v43 = vsub.f32 %v92_v47, %v1051_v21 }
  0x68   :  { %3482 = vmatpush3.bf16.msra.mxu1 %v4100_v27  ;;  %3460 = vmatprep.subr.bf16.mxu0 %v3459_v41  ;;  %v1057_v41 = vand.u32 4294901760, %v94_v38  ;;  %v5478_v59 = vand.u32 4294901760, %v4451_v12 }
  0x69   :  { %3484 = vmatprep.subr.bf16.mxu1 %v4114_v39 }
  0x6b   :  { %3462 = vmatpush3.bf16.msra.mxu0 %v3461_v1  ;;  %v5594_v1 = vand.u32 4294901760, %v4222_v61 }
  0x6c   :  { %3486 = vmatpush3.bf16.msra.mxu1 %v4122_v45  ;;  %3464 = vmatprep.subr.bf16.mxu0 %v3463_v17  ;;  %v5595_v17 = vand.u32 4294901760, %v4233_v56  ;;  %v5600_v56 = vand.u32 4294901760, %v4267_v44  ;;  %v80_v44 = vld [vmem:[#allocation5 + $0x120] sm:$0xff] }
  0x6d   :  { %3488 = vmatprep.subr.bf16.mxu1 %v4144_v62 }
  0x6f   :  { %3466 = vmatpush3.bf16.msra.mxu0 %v3465_v42  ;;  %v3529_v42 = vpack.c.bf16 %v5595_v17, %v5594_v1  ;;  %v98_v17 = vld [vmem:[#allocation5 + $0x1b0] sm:$0xff] }
  0x70   :  { %3490 = vmatpush3.bf16.msra.mxu1 %v4160_v16  ;;  %3468 = vmatprep.subr.bf16.mxu0 %v3467_v50  ;;  %v96_v50 = vld [vmem:[#allocation5 + $0x1a0] sm:$0xff] }
  0x71   :  { %3492 = vmatprep.subr.bf16.mxu1 %v4175_v49 }
  0x73   :  { %3470 = vmatpush3.bf16.msra.mxu0 %v3469_v60  ;;  %v97_v60 = vld [vmem:[#allocation5 + $0x1a8] sm:$0xff] }
  0x74   :  { %3494 = vmatpush3.bf16.msra.mxu1 %v4190_v4  ;;  %3472 = vmatprep.subr.bf16.mxu0 %v3471_v5 }
  0x75   :  { %3496 = vmatprep.subr.bf16.mxu1 %v4205_v48 }
  0x77   :  { %3474 = vmatpush3.bf16.msra.mxu0 %v3473_v30  ;;  %v5603_v30 = vand.u32 4294901760, %v4314_v54 }
  0x78   :  { %3498 = vmatpush3.bf16.msra.mxu1 %v5586_v57  ;;  %3508 = vmatprep.subr.bf16.mxu0 %v3507_v9  ;;  %v1006_v9 = vand.u32 4294901760, %v77_v31 }
  0x79   :  { %3500 = vmatprep.subr.bf16.mxu1 %v5587_v23 }
  0x7a   :  { %617 = vmatmul.mubr.f32.vlgmr.msra.gmra.mrb[2].mxu0 %v4310_v0  ;;  %v4455_v33 = vsub.f32 %v77_v31, %v1006_v9  ;;  %v5596_v0 = vand.u32 4294901760, %v4237_v10  ;;  %v5601_v10 = vand.u32 4294901760, %v4276_v11 }
  0x7b   :  { %3510 = vmatpush3.bf16.msra.mxu0 %v3509_v13  ;;  %891 = vmatprep.mubr.f32.mxu0 %v5588_v29  ;;  %v95_v13 = vld [vmem:[#allocation5 + $0x198] sm:$0xff] }
  0x7c   :  { %3502 = vmatpush3.bf16.msra.mxu1 %v5589_v32  ;;  %3512 = vmatprep.subr.bf16.mxu0 %v3511_v7  ;;  %v4453_v7 = vsub.f32 %v76_v35, %v1003_v26  ;;  %v1060_v3 = vand.u32 4294901760, %v95_v13  ;;  %v4487_v5 = vpack.c.bf16 %v5601_v10, %v5600_v56  ;;  %v81_v35 = vld [vmem:[#allocation5 + $0x128] sm:$0xff]  ;;  %v5469_v31 = vand.u32 4294901760, %v4455_v33 }
  0x7d   :  { %3504 = vmatprep.subr.bf16.mxu1 %v5590_v15 }
  0x7e   :  { %v5475_v11 = vand.u32 4294901760, %v4453_v7  ;;  %v4505_v54 = vpack.c.bf16 %v1060_v3, %v1057_v41 }
  0x7f   :  { %3514 = vmatpush3.bf16.msra.mxu0 %v3513_v18  ;;  %v5592_v18 = vand.u32 4294901760, %v4207_v51  ;;  %v1009_v51 = vand.u32 4294901760, %v78_v46 }
  0x80   :  { %3506 = vmatpush3.bf16.msra.mxu1 %v5591_v28  ;;  %3516 = vmatprep.subr.bf16.mxu0 %v3515_v36  ;;  %v5593_v36 = vand.u32 4294901760, %v4216_v55  ;;  %v1012_v55 = vand.u32 4294901760, %v79_v63  ;;  %5605 = vst [vmem:[#allocation12_spill] sm:$0xff] %v4505_v54 }
  0x81   :  { %3540 = vmatprep.subr.bf16.mxu1 %v4085_v14 }
  0x82   :  { %v3527_v14 = vpack.c.bf16 %v5593_v36, %v5592_v18  ;;  %v1066_v18 = vand.u32 4294901760, %v97_v60  ;;  %v4513_v36 = vpack.c.bf16 %v1012_v55, %v1009_v51 }
  0x83   :  { %725 = vmatmul.mubr.f32.vlgmr.msra.gmra.mrb[2].mxu1 %v244_v6  ;;  %3518 = vmatpush3.bf16.msra.mxu0 %v4383_v34  ;;  %v5597_v6 = vand.u32 4294901760, %v4246_v2  ;;  %v5602_v2 = vand.u32 4294901760, %v4282_v8  ;;  %v4503_v8 = vpack.c.bf16 %v1006_v9, %v1003_v26  ;;  %v1015_v9 = vand.u32 4294901760, %v80_v44 }
  0x84   :  { %3542 = vmatpush3.bf16.msra.mxu1 %v4089_v20  ;;  %3520 = vmatprep.subr.bf16.mxu0 %v4389_v52  ;;  %v5598_v20 = vand.u32 4294901760, %v4252_v53  ;;  %v5599_v52 = vand.u32 4294901760, %v4263_v19  ;;  %v41_v53 = vld [vmem:[#allocation2 + $0x18] sm:$0xff]  ;;  %v4497_v19 = vpack.c.bf16 %v1054_v25, %v1051_v21  ;;  %v4509_v21 = vsub.f32 %v94_v38, %v1057_v41  ;;  %5606 = vst [vmem:[#allocation16_spill] sm:$0xff] %v4513_v36 }
  0x85   :  { %v4474_v34 = vpack.c.bf16 %v5597_v6, %v5596_v0  ;;  %3544 = vmatprep.subr.bf16.mxu1 %v4093_v22  ;;  %v4493_v47 = vpack.c.bf16 %v5603_v30, %v5602_v2  ;;  %995 = vmatprep.mubr.f32.mxu1 %v5588_v29  ;;  %v5479_v22 = vand.u32 4294901760, %v4449_v43  ;;  %5604 = vst [vmem:[#allocation11_spill] sm:$0xff] %v4503_v8  ;;  %v1063_v29 = vand.u32 4294901760, %v96_v50 }
  0x86   :  { %v4481_v61 = vpack.c.bf16 %v5599_v52, %v5598_v20  ;;  %v4511_v25 = vsub.f32 %v95_v13, %v1060_v3  ;;  %v4515_v1 = vand.u32 4294901760, %v41_v53  ;;  %v4523_v38 = vsub.f32 %v79_v63, %v1012_v55  ;;  %v82_v52 = vld [vmem:[#allocation5 + $0x130] sm:$0xff] }
  0x87   :  { %3522 = vmatpush3.bf16.msra.mxu0 %v4395_v40  ;;  %v4518_v40 = vsub.f32 %v78_v46, %v1009_v51  ;;  %v1230_v26 = vsub.f32 %v4449_v43, %v5479_v22  ;;  %v1237_v13 = vsub.f32 %v4451_v12, %v5478_v59  ;;  %v1125_v46 = vsub.f32 %v4455_v33, %v5469_v31  ;;  %v100_v31 = vld [vmem:[#allocation5 + $0x1c0] sm:$0xff]  ;;  %v87_v22 = vld [vmem:[#allocation5 + $0x158] sm:$0xff] }
  0x88   :  { %3546 = vmatpush3.bf16.msra.mxu1 %v4100_v27  ;;  %3524 = vmatprep.subr.bf16.mxu0 %v4401_v58  ;;  %5607 = vst [vmem:[#allocation13_spill] sm:$0xff] %v4515_v1  ;;  %v1018_v27 = vand.u32 4294901760, %v81_v35  ;;  %v99_v58 = vld [vmem:[#allocation5 + $0x1b8] sm:$0xff]  ;;  %v4535_v41 = vpack.c.bf16 %v1066_v18, %v1063_v29  ;;  %v4537_v3 = vsub.f32 %v96_v50, %v1063_v29  ;;  %v1069_v6 = vand.u32 4294901760, %v98_v17 }
  0x89   :  { %3548 = vmatprep.subr.bf16.mxu1 %v4114_v39  ;;  %v1118_v39 = vsub.f32 %v4453_v7, %v5475_v11  ;;  %v4539_v63 = vsub.f32 %v97_v60, %v1066_v18  ;;  %v4542_v0 = vsub.f32 %v41_v53, %v4515_v1  ;;  %v1072_v51 = vand.u32 4294901760, %v99_v58 }
  0x8a   :  { %5608 = vst [vmem:[#allocation14_spill] sm:$0xff] %v4535_v41  ;;  %v5473_v55 = vand.u32 4294901760, %v4509_v21  ;;  %v5470_v20 = vand.u32 4294901760, %v4511_v25  ;;  %v1231_v50 = vand.u32 4294901760, %v1230_v26  ;;  %v4548_v56 = vpack.c.bf16 %v1018_v27, %v1015_v9 }
  0x8b   :  { %3526 = vmatpush3.bf16.msra.mxu0 %v4407_v24  ;;  %v83_v24 = vld [vmem:[#allocation5 + $0x138] sm:$0xff]  ;;  %v4550_v60 = vsub.f32 %v80_v44, %v1015_v9  ;;  %v4552_v10 = vsub.f32 %v81_v35, %v1018_v27  ;;  %v1238_v2 = vand.u32 4294901760, %v1237_v13  ;;  %v5472_v30 = vand.u32 4294901760, %v4518_v40  ;;  %v101_v27 = vld [vmem:[#allocation5 + $0x1c8] sm:$0xff] }
  0x8c   :  { %3550 = vmatpush3.bf16.msra.mxu1 %v4122_v45  ;;  %3528 = vmatprep.subr.bf16.mxu0 %v3527_v14  ;;  %5609 = vst [vmem:[#allocation15_spill] sm:$0xff] %v4548_v56  ;;  %v1119_v45 = vand.u32 4294901760, %v1118_v39  ;;  %v1126_v14 = vand.u32 4294901760, %v1125_v46  ;;  %v1021_v53 = vand.u32 4294901760, %v82_v52  ;;  %v1024_v29 = vand.u32 4294901760, %v83_v24 }
  0x8d   :  { %3552 = vmatprep.subr.bf16.mxu1 %v4144_v62  ;;  %v5471_v18 = vand.u32 4294901760, %v4523_v38  ;;  %v5482_v62 = vand.u32 4294901760, %v4542_v0  ;;  %v4559_v44 = vpack.c.bf16 %v1072_v51, %v1069_v6  ;;  %v1244_v35 = vsub.f32 %v4509_v21, %v5473_v55 }
  0x8e   :  { %v4568_v26 = vsub.f32 %v98_v17, %v1069_v6  ;;  %v4570_v9 = vsub.f32 %v99_v58, %v1072_v51  ;;  %v4574_v13 = vpack.c.bf16 %v1238_v2, %v1231_v50  ;;  %v4576_v39 = vpack.c.bf16 %v1126_v14, %v1119_v45 }
  0x8f   :  { %3530 = vmatpush3.bf16.msra.mxu0 %v3529_v42  ;;  %5610 = vst [vmem:[#allocation17_spill] sm:$0xff] %v4559_v44  ;;  %v1251_v42 = vsub.f32 %v4511_v25, %v5470_v20  ;;  %v1132_v46 = vsub.f32 %v4518_v40, %v5472_v30  ;;  %v1075_v20 = vand.u32 4294901760, %v100_v31  ;;  %v1139_v17 = vsub.f32 %v4523_v38, %v5471_v18 }
  0x90   :  { %3554 = vmatpush3.bf16.msra.mxu1 %v4160_v16  ;;  %3532 = vmatprep.subr.bf16.mxu0 %v4474_v34  ;;  %v5474_v16 = vand.u32 4294901760, %v4537_v3  ;;  %v5477_v34 = vand.u32 4294901760, %v4539_v63  ;;  %v5476_v58 = vand.u32 4294901760, %v4550_v60  ;;  %v1101_v6 = vsub.f32 %v4542_v0, %v5482_v62 }
  0x91   :  { %3556 = vmatprep.subr.bf16.mxu1 %v4175_v49  ;;  %v4582_v49 = vpack.c.bf16 %v1024_v29, %v1021_v53  ;;  %v1245_v51 = vand.u32 4294901760, %v1244_v35  ;;  %v1252_v50 = vand.u32 4294901760, %v1251_v42  ;;  %v1078_v2 = vand.u32 4294901760, %v101_v27  ;;  %v85_v42 = vld [vmem:[#allocation5 + $0x148] sm:$0xff] }
  0x92   :  { %v5481_v45 = vand.u32 4294901760, %v4552_v10  ;;  %v4595_v14 = vsub.f32 %v82_v52, %v1021_v53  ;;  %v4597_v18 = vsub.f32 %v83_v24, %v1024_v29  ;;  %v1258_v30 = vsub.f32 %v4537_v3, %v5474_v16  ;;  %v102_v29 = vld [vmem:[#allocation5 + $0x1d0] sm:$0xff]  ;;  %v103_v16 = vld [vmem:[#allocation5 + $0x1d8] sm:$0xff] }
  0x93   :  { %3534 = vmatpush3.bf16.msra.mxu0 %v4481_v61  ;;  %5611 = vst [vmem:[#allocation18_spill] sm:$0xff] %v4582_v49  ;;  %v84_v61 = vld [vmem:[#allocation5 + $0x140] sm:$0xff]  ;;  %v4605_v35 = vsub.f32 %v100_v31, %v1075_v20  ;;  %v5480_v55 = vand.u32 4294901760, %v4568_v26  ;;  %v1140_v52 = vand.u32 4294901760, %v1139_v17  ;;  %v1146_v53 = vsub.f32 %v4550_v60, %v5476_v58 }
  0x94   :  { %3558 = vmatpush3.bf16.msra.mxu1 %v4190_v4  ;;  %3536 = vmatprep.subr.bf16.mxu0 %v4487_v5  ;;  %v1265_v4 = vsub.f32 %v4539_v63, %v5477_v34  ;;  %v1133_v5 = vand.u32 4294901760, %v1132_v46  ;;  %v1027_v24 = vand.u32 4294901760, %v84_v61  ;;  %v1102_v11 = vand.u32 4294901760, %v1101_v6  ;;  %v86_v6 = vld [vmem:[#allocation5 + $0x150] sm:$0xff] }
  0x95   :  { %3560 = vmatprep.subr.bf16.mxu1 %v4205_v48  ;;  %v5483_v48 = vand.u32 4294901760, %v4570_v9  ;;  %v4615_v31 = vpack.c.bf16 %v1252_v50, %v1245_v51  ;;  %v4617_v46 = vpack.c.bf16 %v1078_v2, %v1075_v20  ;;  %v4623_v17 = vsub.f32 %v101_v27, %v1078_v2 }
  0x96   :  { %v1259_v58 = vand.u32 4294901760, %v1258_v30  ;;  %v1266_v34 = vand.u32 4294901760, %v1265_v4  ;;  %v1030_v59 = vand.u32 4294901760, %v85_v42  ;;  %v1084_v51 = vand.u32 4294901760, %v103_v16 }
  0x97   :  { %3538 = vmatpush3.bf16.msra.mxu0 %v4493_v47  ;;  %5612 = vst [vmem:[#allocation19_spill] sm:$0xff] %v4617_v46  ;;  %v1153_v47 = vsub.f32 %v4552_v10, %v5481_v45  ;;  %v1272_v20 = vsub.f32 %v4568_v26, %v5480_v55  ;;  %v1279_v50 = vsub.f32 %v4570_v9, %v5483_v48  ;;  %v1147_v27 = vand.u32 4294901760, %v1146_v53  ;;  %v104_v48 = vld [vmem:[#allocation5 + $0x1e0] sm:$0xff]  ;;  %v105_v53 = vld [vmem:[#allocation5 + $0x1e8] sm:$0xff] }
  0x98   :  { %3562 = vmatpush3.bf16.msra.mxu1 %v5586_v57  ;;  %3572 = vmatprep.subr.bf16.mxu0 %v4497_v19  ;;  %v1081_v57 = vand.u32 4294901760, %v102_v29  ;;  %v4635_v30 = vsub.f32 %v84_v61, %v1027_v24  ;;  %v1033_v55 = vand.u32 4294901760, %v86_v6  ;;  %v1036_v45 = vand.u32 4294901760, %v87_v22 }
  0x99   :  { %3564 = vmatprep.subr.bf16.mxu1 %v5587_v23  ;;  %v4633_v23 = vpack.c.bf16 %v1140_v52, %v1133_v5  ;;  %v1154_v4 = vand.u32 4294901760, %v1153_v47  ;;  %v5488_v62 = vand.u32 4294901760, %v4597_v18  ;;  %v4642_v5 = vpack.c.bf16 %v1266_v34, %v1259_v58 }
  0x9a   :  { %893 = vmatmul.mubr.f32.vlgmr.msra.gmra.mrb[4].mxu0 %v4297_v37  ;;  %v4644_v61 = vpack.c.bf16 %v1030_v59, %v1027_v24  ;;  %v4646_v52 = vsub.f32 %v85_v42, %v1030_v59  ;;  %v1273_v2 = vand.u32 4294901760, %v1272_v20  ;;  %v1280_v47 = vand.u32 4294901760, %v1279_v50  ;;  %v4679_v50 = vld [vmem:[#allocation5 + $0x168] sm:$0xff] }
  0x9b   :  { %3574 = vmatpush3.bf16.msra.mxu0 %v4503_v8  ;;  %1103 = vmatprep.mubr.f32.mxu0 %v1102_v11  ;;  %v5490_v11 = vand.u32 4294901760, %v4605_v35  ;;  %v4652_v8 = vld [vmem:[#allocation5 + $0x160] sm:$0xff]  ;;  %v4657_v34 = vsub.f32 %v103_v16, %v1084_v51  ;;  %v5616_v59 = vand.u32 4294901760, %v4595_v14  ;;  %v1087_v42 = vand.u32 4294901760, %v104_v48 }
  0x9c   :  { %3566 = vmatpush3.bf16.msra.mxu1 %v5589_v32  ;;  %3576 = vmatprep.subr.bf16.mxu0 %v4505_v54  ;;  %v4649_v32 = vpack.c.bf16 %v1084_v51, %v1081_v57  ;;  %v5489_v54 = vand.u32 4294901760, %v4623_v17  ;;  %v4664_v24 = vpack.c.bf16 %v1154_v4, %v1147_v27  ;;  %v4666_v20 = vpack.c.bf16 %v1036_v45, %v1033_v55 }
  0x9d   :  { %3568 = vmatprep.subr.bf16.mxu1 %v5590_v15  ;;  %v4655_v15 = vsub.f32 %v102_v29, %v1081_v57  ;;  %5615 = vst [vmem:[#allocation22_spill] sm:$0xff] %v4657_v34  ;;  %v1160_v58 = vsub.f32 %v4595_v14, %v5616_v59  ;;  %v1167_v29 = vsub.f32 %v4597_v18, %v5488_v62  ;;  %v1090_v57 = vand.u32 4294901760, %v105_v53 }
  0x9e   :  { %5613 = vst [vmem:[#allocation20_spill] sm:$0xff] %v4649_v32  ;;  %v4672_v16 = vsub.f32 %v86_v6, %v1033_v55  ;;  %v4674_v51 = vsub.f32 %v87_v22, %v1036_v45  ;;  %v5491_v27 = vand.u32 4294901760, %v4652_v8  ;;  %v3615_v4 = vpack.c.bf16 %v1280_v47, %v1273_v2  ;;  %v4689_v22 = vld [vmem:[#allocation5 + $0x1f8] sm:$0xff]  ;;  %v4712_v2 = vld [vmem:[#allocation5 + $0x170] sm:$0xff] }
  0x9f   :  { %3578 = vmatpush3.bf16.msra.mxu0 %v4513_v36  ;;  %5614 = vst [vmem:[#allocation21_spill] sm:$0xff] %v4655_v15  ;;  %v1293_v59 = vsub.f32 %v4623_v17, %v5489_v54  ;;  %v1161_v45 = vand.u32 4294901760, %v1160_v58  ;;  %v4693_v6 = vsub.f32 %v104_v48, %v1087_v42  ;;  %v40_v54 = vld [vmem:[#allocation2 + $0x10] sm:$0xff]  ;;  %v4699_v55 = vpack.c.bf16 %v1090_v57, %v1087_v42  ;;  %v4714_v42 = vld [vmem:[#allocation5 + $0x178] sm:$0xff] }
  0xa0   :  { %3570 = vmatpush3.bf16.msra.mxu1 %v5591_v28  ;;  %3580 = vmatprep.subr.bf16.mxu0 %v4535_v41  ;;  %v1286_v28 = vsub.f32 %v4605_v35, %v5490_v11  ;;  %v1168_v11 = vand.u32 4294901760, %v1167_v29  ;;  %v4701_v62 = vsub.f32 %v105_v53, %v1090_v57  ;;  %v4708_v58 = vsub.f32 %v4652_v8, %v5491_v27 }
  0xa1   :  { %3604 = vmatprep.subr.bf16.mxu1 %v4574_v13  ;;  %v4687_v13 = vld [vmem:[#allocation5 + $0x1f0] sm:$0xff]  ;;  %v1294_v53 = vand.u32 4294901760, %v1293_v59  ;;  %v5617_v29 = vand.u32 4294901760, %v4635_v30  ;;  %v5618_v57 = vand.u32 4294901760, %v4646_v52  ;;  %v4723_v27 = vand.u32 4294901760, %v40_v54 }
  0xa2   :  { %v1287_v48 = vand.u32 4294901760, %v1286_v28  ;;  %v1093_v47 = vand.u32 4294901760, %v4687_v13  ;;  %v5620_v41 = vand.u32 4294901760, %v4657_v34 }
  0xa3   :  { %997 = vmatmul.mubr.f32.vlgmr.msra.gmra.mrb[4].mxu1 %v4297_v37  ;;  %3582 = vmatpush3.bf16.msra.mxu0 %v4548_v56  ;;  %v1042_v37 = vand.u32 4294901760, %v4679_v50  ;;  %v1181_v28 = vsub.f32 %v4646_v52, %v5618_v57  ;;  %v3617_v57 = vpack.c.bf16 %v1168_v11, %v1161_v45 }
  0xa4   :  { %3606 = vmatpush3.bf16.msra.mxu1 %v4576_v39  ;;  %3584 = vmatprep.subr.bf16.mxu0 %v4559_v44  ;;  %v1096_v39 = vand.u32 4294901760, %v4689_v22  ;;  %v5619_v44 = vand.u32 4294901760, %v4655_v15  ;;  %v1307_v59 = vsub.f32 %v4657_v34, %v5620_v41  ;;  %v4743_v41 = vsub.f32 %v4687_v13, %v1093_v47 }
  0xa5   :  { %3608 = vmatprep.subr.bf16.mxu1 %v4615_v31  ;;  %1339 = vmatprep.mubr.f32.mxu1 %v4515_v1  ;;  %v1174_v31 = vsub.f32 %v4635_v30, %v5617_v29  ;;  %v4737_v36 = vsub.f32 %v4679_v50, %v1042_v37  ;;  %v5512_v29 = vand.u32 4294901760, %v4701_v62  ;;  %v3619_v11 = vpack.c.bf16 %v1294_v53, %v1287_v48 }
  0xa6   :  { %v1300_v56 = vsub.f32 %v4655_v15, %v5619_v44  ;;  %v1048_v44 = vand.u32 4294901760, %v4714_v42  ;;  %v4746_v1 = vsub.f32 %v4689_v22, %v1096_v39  ;;  %v1182_v50 = vand.u32 4294901760, %v1181_v28 }
  0xa7   :  { %3586 = vmatpush3.bf16.msra.mxu0 %v4582_v49  ;;  %v1045_v49 = vand.u32 4294901760, %v4712_v2  ;;  %v1175_v45 = vand.u32 4294901760, %v1174_v31  ;;  %v5621_v13 = vand.u32 4294901760, %v4672_v16  ;;  %v5622_v22 = vand.u32 4294901760, %v4674_v51 }
  0xa8   :  { %3610 = vmatpush3.bf16.msra.mxu1 %v4633_v23  ;;  %3588 = vmatprep.subr.bf16.mxu0 %v4617_v46  ;;  %v4751_v46 = vsub.f32 %v40_v54, %v4723_v27  ;;  %v1301_v34 = vand.u32 4294901760, %v1300_v56  ;;  %v4766_v54 = vsub.f32 %v4714_v42, %v1048_v44  ;;  %v5623_v31 = vand.u32 4294901760, %v4693_v6 }
  0xa9   :  { %3612 = vmatprep.subr.bf16.mxu1 %v4642_v5  ;;  %v1308_v5 = vand.u32 4294901760, %v1307_v59  ;;  %v1188_v15 = vsub.f32 %v4672_v16, %v5621_v13  ;;  %v1195_v23 = vsub.f32 %v4674_v51, %v5622_v22  ;;  %v4763_v48 = vsub.f32 %v4712_v2, %v1045_v49 }
  0xaa   :  { %v1314_v28 = vsub.f32 %v4693_v6, %v5623_v31  ;;  %v1327_v59 = vand.u32 4294901760, %v4743_v41  ;;  %v5624_v42 = vand.u32 4294901760, %v4652_v8  ;;  %v4782_v22 = vpack.c.bf16 %v1096_v39, %v1093_v47 }
  0xab   :  { %3590 = vmatpush3.bf16.msra.mxu0 %v4644_v61  ;;  %v3621_v53 = vpack.c.bf16 %v1182_v50, %v1175_v45  ;;  %v3623_v31 = vpack.c.bf16 %v1308_v5, %v1301_v34  ;;  %v1189_v56 = vand.u32 4294901760, %v1188_v15  ;;  %v5626_v8 = vand.u32 4294901760, %v4737_v36 }
  0xac   :  { %3614 = vmatpush3.bf16.msra.mxu1 %v4664_v24  ;;  %3592 = vmatprep.subr.bf16.mxu0 %v4649_v32  ;;  %v1321_v24 = vsub.f32 %v4701_v62, %v5512_v29  ;;  %v4780_v13 = vpack.c.bf16 %v1042_v37, %v5624_v42  ;;  %v1196_v32 = vand.u32 4294901760, %v1195_v23  ;;  %v5625_v29 = vand.u32 4294901760, %v4708_v58 }
  0xad   :  { %3616 = vmatprep.subr.bf16.mxu1 %v3615_v4  ;;  %v1106_v4 = vand.u32 4294901760, %v4751_v46  ;;  %v1209_v47 = vsub.f32 %v4737_v36, %v5626_v8  ;;  %v5513_v37 = vand.u32 4294901760, %v4763_v48  ;;  %v5514_v39 = vand.u32 4294901760, %v4766_v54 }
  0xae   :  { %v1202_v2 = vsub.f32 %v4708_v58, %v5625_v29  ;;  %v1315_v45 = vand.u32 4294901760, %v1314_v28  ;;  %v1322_v34 = vand.u32 4294901760, %v1321_v24  ;;  %v1328_v15 = vsub.f32 %v4743_v41, %v1327_v59 }
  0xaf   :  { %3594 = vmatpush3.bf16.msra.mxu0 %v4666_v20  ;;  %v1107_v29 = vsub.f32 %v4751_v46, %v1106_v4  ;;  %v4805_v50 = vpack.c.bf16 %v1048_v44, %v1045_v49  ;;  %v3625_v5 = vpack.c.bf16 %v1196_v32, %v1189_v56  ;;  %v1210_v24 = vand.u32 4294901760, %v1209_v47 }
  0xb0   :  { %3618 = vmatpush3.bf16.msra.mxu1 %v3617_v57  ;;  %3596 = vmatprep.subr.bf16.mxu0 %v4699_v55  ;;  %v5627_v57 = vand.u32 4294901760, %v4746_v1  ;;  %v1203_v28 = vand.u32 4294901760, %v1202_v2  ;;  %v1216_v42 = vsub.f32 %v4763_v48, %v5513_v37  ;;  %v1223_v8 = vsub.f32 %v4766_v54, %v5514_v39 }
  0xb1   :  { %3620 = vmatprep.subr.bf16.mxu1 %v3619_v11  ;;  %v3635_v11 = vpack.c.bf16 %v4451_v12, %v4449_v43  ;;  %v3627_v49 = vpack.c.bf16 %v1322_v34, %v1315_v45  ;;  %v1329_v44 = vand.u32 4294901760, %v1328_v15  ;;  %v1108_v56 = vand.u32 4294901760, %v1107_v29  ;;  %v5628_v29 = vld [vmem:[#allocation11_spill] sm:$0xff] }
  0xb2   :  { %v1335_v23 = vsub.f32 %v4746_v1, %v5627_v57  ;;  %v3629_v2 = vpack.c.bf16 %v1210_v24, %v1203_v28  ;;  %v3639_v47 = vpack.c.bf16 %v4511_v25, %v4509_v21  ;;  %v1217_v57 = vand.u32 4294901760, %v1216_v42  ;;  %v5631_v24 = vld [vmem:[#allocation16_spill] sm:$0xff]  ;;  %v5632_v42 = vld [vmem:[#allocation21_spill] sm:$0xff] }
  0xb3   :  { %3598 = vmatpush3.bf16.msra.mxu0 %v4780_v13  ;;  %v1224_v37 = vand.u32 4294901760, %v1223_v8  ;;  %v3643_v34 = vpack.c.bf16 %v4539_v63, %v4537_v3  ;;  %v3645_v15 = vpack.c.bf16 %v4552_v10, %v4550_v60  ;;  %v3653_v28 = vpack.c.bf16 %v4646_v52, %v4635_v30  ;;  %v5633_v8 = vld [vmem:[#allocation22_spill] sm:$0xff] }
  0xb4   :  { %3622 = vmatpush3.bf16.msra.mxu1 %v3621_v53  ;;  %3600 = vmatprep.subr.bf16.mxu0 %v4782_v22  ;;  %v1336_v32 = vand.u32 4294901760, %v1335_v23  ;;  %v3637_v53 = vpack.c.bf16 %v4455_v33, %v4453_v7  ;;  %v3647_v23 = vpack.c.bf16 %v4570_v9, %v4568_v26 }
  0xb5   :  { %3624 = vmatprep.subr.bf16.mxu1 %v3623_v31  ;;  %v3641_v31 = vpack.c.bf16 %v4523_v38, %v4518_v40  ;;  %v3633_v45 = vpack.c.bf16 %v1224_v37, %v1217_v57  ;;  %v3649_v37 = vpack.c.bf16 %v4597_v18, %v4595_v14  ;;  %v3663_v57 = vpack.c.bf16 %v4746_v1, %v4743_v41 }
  0xb6   :  { %v3631_v39 = vpack.c.bf16 %v1336_v32, %v1329_v44  ;;  %v5634_v44 = vld [vmem:[#allocation14_spill] sm:$0xff]  ;;  %v3657_v32 = vpack.c.bf16 %v4674_v51, %v4672_v16 }
  0xb7   :  { %3602 = vmatpush3.bf16.msra.mxu0 %v4805_v50 }
  0xb8   :  { %3626 = vmatpush3.bf16.msra.mxu1 %v3625_v5  ;;  %3636 = vmatprep.subr.bf16.mxu0 %v3635_v11  ;;  %v5629_v5 = vld [vmem:[#allocation12_spill] sm:$0xff]  ;;  %v5630_v11 = vand.u32 4294901760, %v4542_v0 }
  0xb9   :  { %3628 = vmatprep.subr.bf16.mxu1 %v3627_v49  ;;  %v3655_v49 = vpack.c.bf16 %v5633_v8, %v5632_v42 }
  0xba   :  { %1109 = vmatmul.mubr.f32.vlgmr.msra.gmra.mrb[6].mxu0 %v1108_v56  ;;  %v5635_v56 = vld [vmem:[#allocation15_spill] sm:$0xff] }
  0xbb   :  { %3638 = vmatpush3.bf16.msra.mxu0 %v3637_v53  ;;  %1476 = vmatprep.mubr.f32.mxu0 %v4542_v0  ;;  %v3659_v0 = vpack.c.bf16 %v4701_v62, %v4693_v6  ;;  %v5636_v53 = vld [vmem:[#allocation17_spill] sm:$0xff] }
  0xbc   :  { %3630 = vmatpush3.bf16.msra.mxu1 %v3629_v2  ;;  %3640 = vmatprep.subr.bf16.mxu0 %v3639_v47  ;;  %v3661_v2 = vpack.c.bf16 %v4737_v36, %v4708_v58  ;;  %v5637_v47 = vld [vmem:[#allocation18_spill] sm:$0xff] }
  0xbd   :  { %3632 = vmatprep.subr.bf16.mxu1 %v3631_v39  ;;  %v3651_v39 = vpack.c.bf16 %v4623_v17, %v4605_v35 }
  0xbf   :  { %3642 = vmatpush3.bf16.msra.mxu0 %v3641_v31  ;;  %v5638_v31 = vld [vmem:[#allocation19_spill] sm:$0xff] }
  0xc0   :  { %3634 = vmatpush3.bf16.msra.mxu1 %v3633_v45  ;;  %3644 = vmatprep.subr.bf16.mxu0 %v3643_v34  ;;  %v3665_v45 = vpack.c.bf16 %v4766_v54, %v4763_v48  ;;  %v5639_v34 = vand.u32 4294901760, %v4449_v43  ;;  %v124_v43 = vld [vmem:[#allocation5 + $0x280] sm:$0xff] }
  0xc1   :  { %3668 = vmatprep.subr.bf16.mxu1 %v4497_v19 }
  0xc3   :  { %1341 = vmatmul.mubr.f32.vlgmr.msra.gmra.mrb[6].mxu1 %v4723_v27  ;;  %3646 = vmatpush3.bf16.msra.mxu0 %v3645_v15  ;;  %v5640_v15 = vand.u32 4294901760, %v4451_v12  ;;  %v5646_v12 = vand.u32 4294901760, %v4518_v40  ;;  %v5651_v40 = vand.u32 4294901760, %v4550_v60  ;;  %v5655_v60 = vand.u32 4294901760, %v4595_v14 }
  0xc4   :  { %3670 = vmatpush3.bf16.msra.mxu1 %v5628_v29  ;;  %3648 = vmatprep.subr.bf16.mxu0 %v3647_v23  ;;  %v5662_v14 = vand.u32 4294901760, %v5633_v8 }
  0xc5   :  { %3672 = vmatprep.subr.bf16.mxu1 %v5629_v5  ;;  %1583 = vmatprep.mubr.f32.mxu1 %v5630_v11  ;;  %v3699_v23 = vpack.c.bf16 %v5640_v15, %v5639_v34  ;;  %v5643_v11 = vand.u32 4294901760, %v4455_v33  ;;  %v1913_v34 = vand.u32 4294901760, %v124_v43  ;;  %v108_v15 = vld [vmem:[#allocation5 + $0x200] sm:$0xff] }
  0xc7   :  { %3650 = vmatpush3.bf16.msra.mxu0 %v3649_v37  ;;  %v5641_v37 = vld [vmem:[#allocation20_spill] sm:$0xff] }
  0xc8   :  { %3674 = vmatpush3.bf16.msra.mxu1 %v5631_v24  ;;  %3652 = vmatprep.subr.bf16.mxu0 %v3651_v39  ;;  %v5642_v39 = vand.u32 4294901760, %v4453_v7  ;;  %v5647_v7 = vand.u32 4294901760, %v4523_v38  ;;  %v5652_v38 = vand.u32 4294901760, %v4552_v10  ;;  %v5656_v10 = vand.u32 4294901760, %v4597_v18 }
  0xc9   :  { %3676 = vmatprep.subr.bf16.mxu1 %v5634_v44 }
  0xca   :  { %v3705_v33 = vpack.c.bf16 %v5647_v7, %v5646_v12  ;;  %v3713_v7 = vpack.c.bf16 %v5656_v10, %v5655_v60  ;;  %v129_v10 = vld [vmem:[#allocation5 + $0x2a8] sm:$0xff] }
  0xcb   :  { %3654 = vmatpush3.bf16.msra.mxu0 %v3653_v28  ;;  %v3701_v28 = vpack.c.bf16 %v5643_v11, %v5642_v39  ;;  %v3709_v39 = vpack.c.bf16 %v5652_v38, %v5651_v40  ;;  %v111_v40 = vld [vmem:[#allocation5 + $0x218] sm:$0xff]  ;;  %v5660_v38 = vand.u32 4294901760, %v4646_v52  ;;  %v5665_v52 = vand.u32 4294901760, %v4693_v6 }
  0xcc   :  { %3678 = vmatpush3.bf16.msra.mxu1 %v5635_v56  ;;  %3656 = vmatprep.subr.bf16.mxu0 %v3655_v49  ;;  %v5644_v49 = vand.u32 4294901760, %v4509_v21  ;;  %v5649_v21 = vand.u32 4294901760, %v4537_v3  ;;  %v5653_v3 = vand.u32 4294901760, %v4568_v26  ;;  %v110_v26 = vld [vmem:[#allocation5 + $0x210] sm:$0xff]  ;;  %v5667_v6 = vand.u32 4294901760, %v4708_v58 }
  0xcd   :  { %3680 = vmatprep.subr.bf16.mxu1 %v5636_v53  ;;  %v5671_v58 = vand.u32 4294901760, %v4766_v54 }
  0xcf   :  { %3658 = vmatpush3.bf16.msra.mxu0 %v3657_v32  ;;  %v5645_v32 = vand.u32 4294901760, %v4511_v25  ;;  %v5650_v25 = vand.u32 4294901760, %v4539_v63  ;;  %v5654_v63 = vand.u32 4294901760, %v4570_v9  ;;  %v5659_v9 = vand.u32 4294901760, %v4635_v30 }
  0xd0   :  { %3682 = vmatpush3.bf16.msra.mxu1 %v5637_v47  ;;  %3660 = vmatprep.subr.bf16.mxu0 %v3659_v0  ;;  %v5664_v30 = vand.u32 4294901760, %v4674_v51  ;;  %v43_v51 = vld [vmem:[#allocation2 + $0x28] sm:$0xff] }
  0xd1   :  { %3684 = vmatprep.subr.bf16.mxu1 %v5638_v31  ;;  %v3703_v0 = vpack.c.bf16 %v5645_v32, %v5644_v49  ;;  %v127_v49 = vld [vmem:[#allocation5 + $0x298] sm:$0xff]  ;;  %v3711_v32 = vpack.c.bf16 %v5654_v63, %v5653_v3  ;;  %v3717_v3 = vpack.c.bf16 %v5660_v38, %v5659_v9 }
  0xd2   :  { %v1922_v60 = vand.u32 4294901760, %v127_v49 }
  0xd3   :  { %3662 = vmatpush3.bf16.msra.mxu0 %v3661_v2  ;;  %v5648_v2 = vld [vmem:[#allocation13_spill] sm:$0xff] }
  0xd4   :  { %3686 = vmatpush3.bf16.msra.mxu1 %v4644_v61  ;;  %3664 = vmatprep.subr.bf16.mxu0 %v3663_v57  ;;  %v3707_v57 = vpack.c.bf16 %v5650_v25, %v5649_v21  ;;  %v5658_v21 = vand.u32 4294901760, %v4623_v17  ;;  %v5663_v17 = vand.u32 4294901760, %v4672_v16  ;;  %v1871_v16 = vand.u32 4294901760, %v110_v26 }
  0xd5   :  { %3688 = vmatprep.subr.bf16.mxu1 %v5641_v37  ;;  %v4960_v38 = vsub.f32 %v127_v49, %v1922_v60  ;;  %v131_v49 = vld [vmem:[#allocation5 + $0x2b8] sm:$0xff] }
  0xd7   :  { %3666 = vmatpush3.bf16.msra.mxu0 %v3665_v45  ;;  %v125_v45 = vld [vmem:[#allocation5 + $0x288] sm:$0xff] }
  0xd8   :  { %3690 = vmatpush3.bf16.msra.mxu1 %v4666_v20  ;;  %3700 = vmatprep.subr.bf16.mxu0 %v3699_v23  ;;  %v109_v23 = vld [vmem:[#allocation5 + $0x208] sm:$0xff]  ;;  %v1916_v11 = vand.u32 4294901760, %v125_v45 }
  0xd9   :  { %3692 = vmatprep.subr.bf16.mxu1 %v4699_v55  ;;  %v1868_v12 = vand.u32 4294901760, %v109_v23 }
  0xda   :  { %1479 = vmatmul.mubr.f32.vlgmr.msra.gmra.mrb[8].mxu0 %v4751_v46 }
  0xdb   :  { %3702 = vmatpush3.bf16.msra.mxu0 %v3701_v28  ;;  %1753 = vmatprep.mubr.f32.mxu0 %v5648_v2  ;;  %v126_v28 = vld [vmem:[#allocation5 + $0x290] sm:$0xff] }
  0xdc   :  { %3694 = vmatpush3.bf16.msra.mxu1 %v4780_v13  ;;  %3704 = vmatprep.subr.bf16.mxu0 %v3703_v0  ;;  %v1865_v0 = vand.u32 4294901760, %v108_v15  ;;  %v1919_v63 = vand.u32 4294901760, %v126_v28 }
  0xdd   :  { %3696 = vmatprep.subr.bf16.mxu1 %v4782_v22 }
  0xde   :  { %v4933_v46 = vsub.f32 %v108_v15, %v1865_v0 }
  0xdf   :  { %3706 = vmatpush3.bf16.msra.mxu0 %v3705_v33  ;;  %v5657_v33 = vand.u32 4294901760, %v4605_v35  ;;  %v128_v35 = vld [vmem:[#allocation5 + $0x2a0] sm:$0xff] }
  0xe0   :  { %3698 = vmatpush3.bf16.msra.mxu1 %v4805_v50  ;;  %3708 = vmatprep.subr.bf16.mxu0 %v3707_v57  ;;  %v4906_v57 = vsub.f32 %v124_v43, %v1913_v34  ;;  %v4922_v43 = vpack.c.bf16 %v5664_v30, %v5663_v17  ;;  %v5515_v17 = vand.u32 4294901760, %v4960_v38 }
  0xe1   :  { %3732 = vmatprep.subr.bf16.mxu1 %v4497_v19  ;;  %v3715_v25 = vpack.c.bf16 %v5658_v21, %v5657_v33  ;;  %v5661_v19 = vand.u32 4294901760, %v5632_v42  ;;  %v5666_v42 = vand.u32 4294901760, %v4701_v62  ;;  %v4930_v33 = vsub.f32 %v125_v45, %v1916_v11 }
  0xe2   :  { %v5668_v62 = vand.u32 4294901760, %v4737_v36  ;;  %v1925_v45 = vand.u32 4294901760, %v128_v35  ;;  %v5525_v15 = vand.u32 4294901760, %v4906_v57  ;;  %v4958_v36 = vsub.f32 %v126_v28, %v1919_v63 }
  0xe3   :  { %v3719_v18 = vpack.c.bf16 %v5662_v14, %v5661_v19  ;;  %1587 = vmatmul.mubr.f32.vlgmr.msra.gmra.mrb[8].mxu1 %v1106_v4  ;;  %3710 = vmatpush3.bf16.msra.mxu0 %v3709_v39  ;;  %v4928_v8 = vpack.c.bf16 %v5666_v42, %v5665_v52  ;;  %v4935_v4 = vsub.f32 %v109_v23, %v1868_v12  ;;  %v1874_v39 = vand.u32 4294901760, %v111_v40 }
  0xe4   :  { %3734 = vmatpush3.bf16.msra.mxu1 %v5628_v29  ;;  %3712 = vmatprep.subr.bf16.mxu0 %v3711_v32  ;;  %v4942_v21 = vpack.c.bf16 %v5668_v62, %v5667_v6  ;;  %v1928_v29 = vand.u32 4294901760, %v129_v10  ;;  %v5669_v23 = vand.u32 4294901760, %v4746_v1  ;;  %v4964_v19 = vpack.c.bf16 %v1868_v12, %v1865_v0  ;;  %v112_v1 = vld [vmem:[#allocation5 + $0x220] sm:$0xff] }
  0xe5   :  { %3736 = vmatprep.subr.bf16.mxu1 %v5629_v5  ;;  %1857 = vmatprep.mubr.f32.mxu1 %v5648_v2  ;;  %v5670_v5 = vand.u32 4294901760, %v4763_v48  ;;  %v4962_v2 = vpack.c.bf16 %v1916_v11, %v1913_v34  ;;  %v5523_v41 = vand.u32 4294901760, %v4930_v33  ;;  %v4967_v14 = vand.u32 4294901760, %v43_v51  ;;  %v130_v11 = vld [vmem:[#allocation5 + $0x2b0] sm:$0xff] }
  0xe6   :  { %v4950_v32 = vpack.c.bf16 %v5669_v23, %v1327_v59  ;;  %5672 = vst [vmem:[#allocation11_spill] sm:$0xff] %v4964_v19  ;;  %v113_v59 = vld [vmem:[#allocation5 + $0x228] sm:$0xff]  ;;  %v4970_v48 = vpack.c.bf16 %v1922_v60, %v1919_v63  ;;  %v4972_v54 = vpack.c.bf16 %v1874_v39, %v1871_v16  ;;  %v5520_v28 = vand.u32 4294901760, %v4933_v46 }
  0xe7   :  { %v4956_v9 = vpack.c.bf16 %v5671_v58, %v5670_v5  ;;  %3714 = vmatpush3.bf16.msra.mxu0 %v3713_v7  ;;  %5673 = vst [vmem:[#allocation12_spill] sm:$0xff] %v4967_v14  ;;  %v5519_v34 = vand.u32 4294901760, %v4935_v4  ;;  %v4977_v0 = vsub.f32 %v110_v26, %v1871_v16  ;;  %v4979_v12 = vsub.f32 %v111_v40, %v1874_v39 }
  0xe8   :  { %3738 = vmatpush3.bf16.msra.mxu1 %v5631_v24  ;;  %3716 = vmatprep.subr.bf16.mxu0 %v3715_v25  ;;  %5674 = vst [vmem:[#allocation16_spill] sm:$0xff] %v4970_v48  ;;  %5675 = vst [vmem:[#allocation21_spill] sm:$0xff] %v4972_v54  ;;  %v4981_v7 = vpack.c.bf16 %v1928_v29, %v1925_v45  ;;  %v2092_v24 = vsub.f32 %v4906_v57, %v5525_v15  ;;  %v1877_v25 = vand.u32 4294901760, %v112_v1 }
  0xe9   :  { %3740 = vmatprep.subr.bf16.mxu1 %v5634_v44  ;;  %v1880_v63 = vand.u32 4294901760, %v113_v59  ;;  %v5516_v60 = vand.u32 4294901760, %v4958_v36  ;;  %v2099_v44 = vsub.f32 %v4930_v33, %v5523_v41  ;;  %v1931_v26 = vand.u32 4294901760, %v130_v11 }
  0xea   :  { %5676 = vst [vmem:[#allocation22_spill] sm:$0xff] %v4981_v7  ;;  %v1934_v40 = vand.u32 4294901760, %v131_v49  ;;  %v4992_v30 = vsub.f32 %v43_v51, %v4967_v14  ;;  %v4995_v52 = vsub.f32 %v128_v35, %v1925_v45  ;;  %v1980_v42 = vsub.f32 %v4933_v46, %v5520_v28  ;;  %v114_v51 = vld [vmem:[#allocation5 + $0x230] sm:$0xff]  ;;  %v117_v28 = vld [vmem:[#allocation5 + $0x248] sm:$0xff] }
  0xeb   :  { %3718 = vmatpush3.bf16.msra.mxu0 %v3717_v3  ;;  %v1987_v3 = vsub.f32 %v4935_v4, %v5519_v34  ;;  %v5004_v16 = vsub.f32 %v129_v10, %v1928_v29  ;;  %v2093_v39 = vand.u32 4294901760, %v2092_v24  ;;  %v5518_v6 = vand.u32 4294901760, %v4977_v0  ;;  %v115_v10 = vld [vmem:[#allocation5 + $0x238] sm:$0xff] }
  0xec   :  { %3742 = vmatpush3.bf16.msra.mxu1 %v5635_v56  ;;  %3720 = vmatprep.subr.bf16.mxu0 %v3719_v18  ;;  %v5517_v56 = vand.u32 4294901760, %v4979_v12  ;;  %v5008_v18 = vpack.c.bf16 %v1880_v63, %v1877_v25  ;;  %v5010_v35 = vsub.f32 %v112_v1, %v1877_v25  ;;  %v2106_v62 = vsub.f32 %v4958_v36, %v5516_v60  ;;  %v133_v60 = vld [vmem:[#allocation5 + $0x2c8] sm:$0xff] }
  0xed   :  { %3744 = vmatprep.subr.bf16.mxu1 %v5636_v53  ;;  %v2113_v53 = vsub.f32 %v4960_v38, %v5515_v17  ;;  %v2100_v45 = vand.u32 4294901760, %v2099_v44  ;;  %v5019_v29 = vsub.f32 %v113_v59, %v1880_v63  ;;  %v5021_v23 = vpack.c.bf16 %v1934_v40, %v1931_v26  ;;  %v132_v17 = vld [vmem:[#allocation5 + $0x2c0] sm:$0xff] }
  0xee   :  { %5677 = vst [vmem:[#allocation14_spill] sm:$0xff] %v5008_v18  ;;  %v5526_v5 = vand.u32 4294901760, %v4992_v30  ;;  %v1981_v58 = vand.u32 4294901760, %v1980_v42  ;;  %v1988_v1 = vand.u32 4294901760, %v1987_v3  ;;  %v5026_v24 = vsub.f32 %v130_v11, %v1931_v26  ;;  %v116_v42 = vld [vmem:[#allocation5 + $0x240] sm:$0xff] }
  0xef   :  { %3722 = vmatpush3.bf16.msra.mxu0 %v4922_v43  ;;  %5678 = vst [vmem:[#allocation15_spill] sm:$0xff] %v5021_v23  ;;  %v1883_v25 = vand.u32 4294901760, %v114_v51  ;;  %v5029_v43 = vsub.f32 %v131_v49, %v1934_v40  ;;  %v1886_v59 = vand.u32 4294901760, %v115_v10  ;;  %v1994_v63 = vsub.f32 %v4977_v0, %v5518_v6 }
  0xf0   :  { %3746 = vmatpush3.bf16.msra.mxu1 %v5637_v47  ;;  %3724 = vmatprep.subr.bf16.mxu0 %v4928_v8  ;;  %v2001_v47 = vsub.f32 %v4979_v12, %v5517_v56  ;;  %v2107_v8 = vand.u32 4294901760, %v2106_v62  ;;  %v2114_v44 = vand.u32 4294901760, %v2113_v53  ;;  %v5522_v11 = vand.u32 4294901760, %v4995_v52 }
  0xf1   :  { %3748 = vmatprep.subr.bf16.mxu1 %v5638_v31  ;;  %v5521_v26 = vand.u32 4294901760, %v5004_v16  ;;  %v5040_v31 = vpack.c.bf16 %v2100_v45, %v2093_v39  ;;  %v1937_v49 = vand.u32 4294901760, %v132_v17  ;;  %v1940_v40 = vand.u32 4294901760, %v133_v60 }
  0xf2   :  { %v1963_v3 = vsub.f32 %v4992_v30, %v5526_v5  ;;  %v5047_v62 = vpack.c.bf16 %v1988_v1, %v1981_v58  ;;  %v5049_v53 = vsub.f32 %v114_v51, %v1883_v25  ;;  %v5524_v56 = vand.u32 4294901760, %v5010_v35  ;;  %v135_v1 = vld [vmem:[#allocation5 + $0x2d8] sm:$0xff] }
  0xf3   :  { %3726 = vmatpush3.bf16.msra.mxu0 %v4942_v21  ;;  %v5527_v21 = vand.u32 4294901760, %v5019_v29  ;;  %v5054_v39 = vpack.c.bf16 %v1886_v59, %v1883_v25  ;;  %v5056_v45 = vsub.f32 %v115_v10, %v1886_v59  ;;  %v1995_v6 = vand.u32 4294901760, %v1994_v63  ;;  %v134_v10 = vld [vmem:[#allocation5 + $0x2d0] sm:$0xff]  ;;  %v119_v5 = vld [vmem:[#allocation5 + $0x258] sm:$0xff] }
  0xf4   :  { %3750 = vmatpush3.bf16.msra.mxu1 %v4644_v61  ;;  %3728 = vmatprep.subr.bf16.mxu0 %v4950_v32  ;;  %v2002_v34 = vand.u32 4294901760, %v2001_v47  ;;  %v5058_v61 = vpack.c.bf16 %v2114_v44, %v2107_v8  ;;  %v2120_v32 = vsub.f32 %v4995_v52, %v5522_v11  ;;  %v2127_v51 = vsub.f32 %v5004_v16, %v5521_v26 }
  0xf5   :  { %3752 = vmatprep.subr.bf16.mxu1 %v5641_v37  ;;  %5679 = vst [vmem:[#allocation17_spill] sm:$0xff] %v5054_v39  ;;  %v1889_v58 = vand.u32 4294901760, %v116_v42  ;;  %v5067_v37 = vpack.c.bf16 %v1940_v40, %v1937_v49  ;;  %v5529_v25 = vand.u32 4294901760, %v5026_v24  ;;  %v5528_v59 = vand.u32 4294901760, %v5029_v43 }
  0xf6   :  { %v1964_v63 = vand.u32 4294901760, %v1963_v3  ;;  %v5073_v47 = vsub.f32 %v132_v17, %v1937_v49  ;;  %v1892_v8 = vand.u32 4294901760, %v117_v28  ;;  %v2015_v44 = vsub.f32 %v5019_v29, %v5527_v21 }
  0xf7   :  { %3730 = vmatpush3.bf16.msra.mxu0 %v4956_v9  ;;  %5680 = vst [vmem:[#allocation18_spill] sm:$0xff] %v5067_v37  ;;  %v2008_v9 = vsub.f32 %v5010_v35, %v5524_v56  ;;  %v5082_v26 = vpack.c.bf16 %v2002_v34, %v1995_v6  ;;  %v5084_v3 = vsub.f32 %v133_v60, %v1940_v40  ;;  %v5532_v11 = vand.u32 4294901760, %v5049_v53 }
  0xf8   :  { %3754 = vmatpush3.bf16.msra.mxu1 %v4666_v20  ;;  %3764 = vmatprep.subr.bf16.mxu0 %v4962_v2  ;;  %v118_v20 = vld [vmem:[#allocation5 + $0x250] sm:$0xff]  ;;  %v5535_v17 = vand.u32 4294901760, %v5056_v45  ;;  %v2121_v49 = vand.u32 4294901760, %v2120_v32  ;;  %v2128_v41 = vand.u32 4294901760, %v2127_v51  ;;  %v1943_v56 = vand.u32 4294901760, %v134_v10 }
  0xf9   :  { %3756 = vmatprep.subr.bf16.mxu1 %v4699_v55  ;;  %v1946_v15 = vand.u32 4294901760, %v135_v1  ;;  %v5090_v21 = vsub.f32 %v116_v42, %v1889_v58  ;;  %v2134_v55 = vsub.f32 %v5026_v24, %v5529_v25  ;;  %v2141_v34 = vsub.f32 %v5029_v43, %v5528_v59  ;;  %v136_v59 = vld [vmem:[#allocation5 + $0x2e0] sm:$0xff] }
  0xfa   :  { %1755 = vmatmul.mubr.f32.vlgmr.msra.gmra.mrb[10].mxu0 %v4723_v27  ;;  %v5100_v60 = vpack.c.bf16 %v1892_v8, %v1889_v58  ;;  %v2009_v6 = vand.u32 4294901760, %v2008_v9  ;;  %v2016_v40 = vand.u32 4294901760, %v2015_v44  ;;  %v1895_v32 = vand.u32 4294901760, %v118_v20  ;;  %v5128_v25 = vld [vmem:[#allocation5 + $0x260] sm:$0xff] }
  0xfb   :  { %3766 = vmatpush3.bf16.msra.mxu0 %v4964_v19  ;;  %1965 = vmatprep.mubr.f32.mxu0 %v1964_v63  ;;  %v1898_v42 = vand.u32 4294901760, %v119_v5  ;;  %v2022_v51 = vsub.f32 %v5049_v53, %v5532_v11  ;;  %v2029_v63 = vsub.f32 %v5056_v45, %v5535_v17  ;;  %v5110_v58 = vpack.c.bf16 %v2128_v41, %v2121_v49 }
  0xfc   :  { %3758 = vmatpush3.bf16.msra.mxu1 %v4780_v13  ;;  %3768 = vmatprep.subr.bf16.mxu0 %v4970_v48  ;;  %v137_v13 = vld [vmem:[#allocation5 + $0x2e8] sm:$0xff]  ;;  %v5112_v9 = vsub.f32 %v117_v28, %v1892_v8  ;;  %v5114_v44 = vpack.c.bf16 %v1946_v15, %v1943_v56  ;;  %v5118_v48 = vsub.f32 %v134_v10, %v1943_v56  ;;  %v2135_v19 = vand.u32 4294901760, %v2134_v55 }
  0xfd   :  { %3760 = vmatprep.subr.bf16.mxu1 %v4782_v22  ;;  %v5536_v22 = vand.u32 4294901760, %v5084_v3  ;;  %v5120_v11 = vsub.f32 %v135_v1, %v1946_v15  ;;  %v2142_v17 = vand.u32 4294901760, %v2141_v34  ;;  %v5124_v41 = vpack.c.bf16 %v2016_v40, %v2009_v6  ;;  %v5136_v55 = vld [vmem:[#allocation5 + $0x268] sm:$0xff]  ;;  %v5145_v40 = vld [vmem:[#allocation5 + $0x2f0] sm:$0xff] }
  0xfe   :  { %5681 = vst [vmem:[#allocation19_spill] sm:$0xff] %v5118_v48  ;;  %v5126_v28 = vsub.f32 %v118_v20, %v1895_v32  ;;  %v1949_v8 = vand.u32 4294901760, %v136_v59  ;;  %v1952_v49 = vand.u32 4294901760, %v137_v13  ;;  %v5131_v56 = vpack.c.bf16 %v1898_v42, %v1895_v32  ;;  %v5147_v32 = vld [vmem:[#allocation5 + $0x2f8] sm:$0xff] }
  0xff   :  { %3770 = vmatpush3.bf16.msra.mxu0 %v4972_v54  ;;  %5682 = vst [vmem:[#allocation20_spill] sm:$0xff] %v5120_v11  ;;  %v2023_v15 = vand.u32 4294901760, %v2022_v51  ;;  %v2030_v10 = vand.u32 4294901760, %v2029_v63  ;;  %v5683_v1 = vand.u32 4294901760, %v5073_v47  ;;  %v5138_v34 = vsub.f32 %v119_v5, %v1898_v42 }
 0x100   :  { %3762 = vmatpush3.bf16.msra.mxu1 %v4805_v50  ;;  %3772 = vmatprep.subr.bf16.mxu0 %v4981_v7  ;;  %v2155_v20 = vsub.f32 %v5084_v3, %v5536_v22  ;;  %v3807_v51 = vpack.c.bf16 %v2142_v17, %v2135_v19  ;;  %v1901_v5 = vand.u32 4294901760, %v5128_v25  ;;  %v5156_v22 = vpack.c.bf16 %v1952_v49, %v1949_v8 }
 0x101   :  { %3796 = vmatprep.subr.bf16.mxu1 %v5040_v31  ;;  %v2148_v50 = vsub.f32 %v5073_v47, %v5683_v1  ;;  %v42_v1 = vld [vmem:[#allocation2 + $0x20] sm:$0xff]  ;;  %v5158_v31 = vsub.f32 %v136_v59, %v1949_v8  ;;  %v5160_v6 = vsub.f32 %v137_v13, %v1952_v49  ;;  %v3809_v19 = vpack.c.bf16 %v2030_v10, %v2023_v15 }
 0x102   :  { %v1955_v42 = vand.u32 4294901760, %v5145_v40  ;;  %v1958_v63 = vand.u32 4294901760, %v5147_v32  ;;  %v2156_v59 = vand.u32 4294901760, %v2155_v20  ;;  %v5684_v13 = vand.u32 4294901760, %v5090_v21 }
 0x103   :  { %1859 = vmatmul.mubr.f32.vlgmr.msra.gmra.mrb[10].mxu1 %v4723_v27  ;;  %3774 = vmatpush3.bf16.msra.mxu0 %v5008_v18  ;;  %v1904_v27 = vand.u32 4294901760, %v5136_v55  ;;  %v2149_v17 = vand.u32 4294901760, %v2148_v50  ;;  %v5166_v18 = vld [vmem:[#allocation5 + $0x270] sm:$0xff]  ;;  %v5685_v49 = vand.u32 4294901760, %v5112_v9  ;;  %v5177_v15 = vand.u32 4294901760, %v42_v1 }
 0x104   :  { %3798 = vmatpush3.bf16.msra.mxu1 %v5047_v62  ;;  %3776 = vmatprep.subr.bf16.mxu0 %v5021_v23  ;;  %v5168_v62 = vld [vmem:[#allocation5 + $0x278] sm:$0xff]  ;;  %v2036_v8 = vsub.f32 %v5090_v21, %v5684_v13  ;;  %v5686_v10 = vand.u32 4294901760, %v5118_v48  ;;  %v5687_v23 = vand.u32 4294901760, %v5120_v11  ;;  %v5203_v13 = vsub.f32 %v5147_v32, %v1958_v63 }
 0x105   :  { %3800 = vmatprep.subr.bf16.mxu1 %v5058_v61  ;;  %2201 = vmatprep.mubr.f32.mxu1 %v4967_v14  ;;  %v2043_v61 = vsub.f32 %v5112_v9, %v5685_v49  ;;  %v5191_v49 = vsub.f32 %v5128_v25, %v1901_v5  ;;  %v1910_v7 = vand.u32 4294901760, %v5168_v62  ;;  %v5555_v25 = vand.u32 4294901760, %v5160_v6 }
 0x106   :  { %v2162_v50 = vsub.f32 %v5118_v48, %v5686_v10  ;;  %v2169_v20 = vsub.f32 %v5120_v11, %v5687_v23  ;;  %v1907_v10 = vand.u32 4294901760, %v5166_v18  ;;  %v5200_v23 = vsub.f32 %v5145_v40, %v1955_v42 }
 0x107   :  { %3778 = vmatpush3.bf16.msra.mxu0 %v5054_v39  ;;  %v5194_v39 = vsub.f32 %v5136_v55, %v1904_v27  ;;  %v3811_v14 = vpack.c.bf16 %v2156_v59, %v2149_v17  ;;  %v2044_v55 = vand.u32 4294901760, %v2043_v61  ;;  %v5208_v11 = vsub.f32 %v42_v1, %v5177_v15 }
 0x108   :  { %3802 = vmatpush3.bf16.msra.mxu1 %v5082_v26  ;;  %3780 = vmatprep.subr.bf16.mxu0 %v5067_v37  ;;  %v2037_v37 = vand.u32 4294901760, %v2036_v8  ;;  %v2163_v48 = vand.u32 4294901760, %v2162_v50  ;;  %v5688_v40 = vand.u32 4294901760, %v5126_v28  ;;  %v5689_v32 = vand.u32 4294901760, %v5138_v34 }
 0x109   :  { %3804 = vmatprep.subr.bf16.mxu1 %v5110_v58  ;;  %v2170_v58 = vand.u32 4294901760, %v2169_v20  ;;  %v5220_v17 = vsub.f32 %v5166_v18, %v1907_v10  ;;  %v5223_v1 = vsub.f32 %v5168_v62, %v1910_v7  ;;  %v5690_v61 = vand.u32 4294901760, %v5158_v31 }
 0x10a   :  { %v2050_v54 = vsub.f32 %v5126_v28, %v5688_v40  ;;  %v2057_v26 = vsub.f32 %v5138_v34, %v5689_v32  ;;  %v5557_v18 = vand.u32 4294901760, %v5203_v13  ;;  %v5235_v40 = vpack.c.bf16 %v1904_v27, %v1901_v5 }
 0x10b   :  { %3782 = vmatpush3.bf16.msra.mxu0 %v5100_v60  ;;  %v2176_v50 = vsub.f32 %v5158_v31, %v5690_v61  ;;  %v5237_v62 = vpack.c.bf16 %v1958_v63, %v1955_v42  ;;  %v1968_v32 = vand.u32 4294901760, %v5208_v11  ;;  %v3815_v8 = vpack.c.bf16 %v2170_v58, %v2163_v48 }
 0x10c   :  { %3806 = vmatpush3.bf16.msra.mxu1 %v5124_v41  ;;  %3784 = vmatprep.subr.bf16.mxu0 %v5114_v44  ;;  %v2183_v41 = vsub.f32 %v5160_v6, %v5555_v25  ;;  %v2051_v59 = vand.u32 4294901760, %v2050_v54  ;;  %v2058_v61 = vand.u32 4294901760, %v2057_v26  ;;  %v5691_v25 = vand.u32 4294901760, %v5191_v49 }
 0x10d   :  { %3808 = vmatprep.subr.bf16.mxu1 %v3807_v51  ;;  %v3813_v51 = vpack.c.bf16 %v2044_v55, %v2037_v37  ;;  %v5692_v5 = vand.u32 4294901760, %v5194_v39  ;;  %v5556_v63 = vand.u32 4294901760, %v5220_v17  ;;  %v5558_v27 = vand.u32 4294901760, %v5223_v1 }
 0x10e   :  { %v2064_v20 = vsub.f32 %v5191_v49, %v5691_v25  ;;  %v2177_v37 = vand.u32 4294901760, %v2176_v50  ;;  %v2184_v48 = vand.u32 4294901760, %v2183_v41  ;;  %v5693_v54 = vand.u32 4294901760, %v5200_v23 }
 0x10f   :  { %3786 = vmatpush3.bf16.msra.mxu0 %v5131_v56  ;;  %v2071_v42 = vsub.f32 %v5194_v39, %v5692_v5  ;;  %v2197_v26 = vsub.f32 %v5203_v13, %v5557_v18  ;;  %v1969_v25 = vsub.f32 %v5208_v11, %v1968_v32  ;;  %v5260_v55 = vpack.c.bf16 %v1910_v7, %v1907_v10 }
 0x110   :  { %3810 = vmatpush3.bf16.msra.mxu1 %v3809_v19  ;;  %3788 = vmatprep.subr.bf16.mxu0 %v5156_v22  ;;  %v2190_v19 = vsub.f32 %v5200_v23, %v5693_v54  ;;  %v3817_v58 = vpack.c.bf16 %v2058_v61, %v2051_v59  ;;  %v2065_v50 = vand.u32 4294901760, %v2064_v20  ;;  %v2078_v5 = vsub.f32 %v5220_v17, %v5556_v63 }
 0x111   :  { %3812 = vmatprep.subr.bf16.mxu1 %v3811_v14  ;;  %v3827_v14 = vpack.c.bf16 %v4930_v33, %v4906_v57  ;;  %v2072_v41 = vand.u32 4294901760, %v2071_v42  ;;  %v2085_v54 = vsub.f32 %v5223_v1, %v5558_v27  ;;  %v3819_v7 = vpack.c.bf16 %v2184_v48, %v2177_v37 }
 0x112   :  { %v2191_v10 = vand.u32 4294901760, %v2190_v19  ;;  %v2198_v59 = vand.u32 4294901760, %v2197_v26  ;;  %v1970_v61 = vand.u32 4294901760, %v1969_v25  ;;  %v3831_v42 = vpack.c.bf16 %v4960_v38, %v4958_v36  ;;  %v5695_v25 = vld [vmem:[#allocation16_spill] sm:$0xff] }
 0x113   :  { %3790 = vmatpush3.bf16.msra.mxu0 %v5235_v40  ;;  %v3821_v20 = vpack.c.bf16 %v2072_v41, %v2065_v50  ;;  %v2079_v63 = vand.u32 4294901760, %v2078_v5  ;;  %v2086_v18 = vand.u32 4294901760, %v2085_v54  ;;  %v3835_v48 = vpack.c.bf16 %v5004_v16, %v4995_v52  ;;  %v5697_v50 = vld [vmem:[#allocation21_spill] sm:$0xff]  ;;  %v5698_v41 = vld [vmem:[#allocation19_spill] sm:$0xff]  ;;  %v5699_v5 = vld [vmem:[#allocation20_spill] sm:$0xff] }
 0x114   :  { %3814 = vmatpush3.bf16.msra.mxu1 %v3813_v51  ;;  %3792 = vmatprep.subr.bf16.mxu0 %v5237_v62  ;;  %v3829_v51 = vpack.c.bf16 %v4935_v4, %v4933_v46  ;;  %v3823_v27 = vpack.c.bf16 %v2198_v59, %v2191_v10  ;;  %v3837_v19 = vpack.c.bf16 %v5019_v29, %v5010_v35  ;;  %v5701_v59 = vld [vmem:[#allocation14_spill] sm:$0xff] }
 0x115   :  { %3816 = vmatprep.subr.bf16.mxu1 %v3815_v8  ;;  %v3833_v8 = vpack.c.bf16 %v4979_v12, %v4977_v0  ;;  %v3825_v37 = vpack.c.bf16 %v2086_v18, %v2079_v63  ;;  %v3839_v26 = vpack.c.bf16 %v5029_v43, %v5026_v24  ;;  %v3841_v18 = vpack.c.bf16 %v5056_v45, %v5049_v53  ;;  %v5694_v63 = vld [vmem:[#allocation11_spill] sm:$0xff] }
 0x116   :  { %v3847_v54 = vpack.c.bf16 %v5699_v5, %v5698_v41  ;;  %v3849_v10 = vpack.c.bf16 %v5138_v34, %v5126_v28 }
 0x117   :  { %3794 = vmatpush3.bf16.msra.mxu0 %v5260_v55 }
 0x118   :  { %3818 = vmatpush3.bf16.msra.mxu1 %v3817_v58  ;;  %3828 = vmatprep.subr.bf16.mxu0 %v3827_v14  ;;  %v5696_v58 = vand.u32 4294901760, %v4992_v30  ;;  %v3845_v14 = vpack.c.bf16 %v5112_v9, %v5090_v21 }
 0x119   :  { %3820 = vmatprep.subr.bf16.mxu1 %v3819_v7  ;;  %v5700_v7 = vld [vmem:[#allocation22_spill] sm:$0xff] }
 0x11a   :  { %1971 = vmatmul.mubr.f32.vlgmr.msra.gmra.mrb[12].mxu0 %v1970_v61  ;;  %v5702_v61 = vld [vmem:[#allocation15_spill] sm:$0xff] }
 0x11b   :  { %3830 = vmatpush3.bf16.msra.mxu0 %v3829_v51  ;;  %2338 = vmatprep.mubr.f32.mxu0 %v4992_v30  ;;  %v3851_v30 = vpack.c.bf16 %v5160_v6, %v5158_v31 }
 0x11c   :  { %3822 = vmatpush3.bf16.msra.mxu1 %v3821_v20  ;;  %3832 = vmatprep.subr.bf16.mxu0 %v3831_v42  ;;  %v3853_v42 = vpack.c.bf16 %v5194_v39, %v5191_v49 }
 0x11d   :  { %3824 = vmatprep.subr.bf16.mxu1 %v3823_v27  ;;  %v3843_v27 = vpack.c.bf16 %v5084_v3, %v5073_v47 }
 0x11f   :  { %3834 = vmatpush3.bf16.msra.mxu0 %v3833_v8 }
 0x120   :  { %3826 = vmatpush3.bf16.msra.mxu1 %v3825_v37  ;;  %3836 = vmatprep.subr.bf16.mxu0 %v3835_v48  ;;  %v5703_v37 = vld [vmem:[#allocation17_spill] sm:$0xff]  ;;  %v3855_v48 = vpack.c.bf16 %v5203_v13, %v5200_v23 }
 0x121   :  { %3860 = vmatprep.subr.bf16.mxu1 %v4962_v2 }
 0x123   :  { %2203 = vmatmul.mubr.f32.vlgmr.msra.gmra.mrb[12].mxu1 %v5177_v15  ;;  %3838 = vmatpush3.bf16.msra.mxu0 %v3837_v19  ;;  %v5704_v19 = vld [vmem:[#allocation18_spill] sm:$0xff] }
 0x124   :  { %3862 = vmatpush3.bf16.msra.mxu1 %v5694_v63  ;;  %3840 = vmatprep.subr.bf16.mxu0 %v3839_v26  ;;  %v3857_v26 = vpack.c.bf16 %v5223_v1, %v5220_v17 }
 0x125   :  { %3864 = vmatprep.subr.bf16.mxu1 %v5695_v25  ;;  %2445 = vmatprep.mubr.f32.mxu1 %v5696_v58 }
 0x127   :  { %3842 = vmatpush3.bf16.msra.mxu0 %v3841_v18  ;;  %v5705_v18 = vand.u32 4294901760, %v4906_v57  ;;  %v5710_v57 = vand.u32 4294901760, %v4960_v38  ;;  %v5715_v38 = vand.u32 4294901760, %v5004_v16  ;;  %v5721_v16 = vand.u32 4294901760, %v5056_v45 }
 0x128   :  { %3866 = vmatpush3.bf16.msra.mxu1 %v5697_v50  ;;  %3844 = vmatprep.subr.bf16.mxu0 %v3843_v27  ;;  %v5706_v27 = vand.u32 4294901760, %v4930_v33  ;;  %v5726_v45 = vand.u32 4294901760, %v5698_v41 }
 0x129   :  { %3868 = vmatprep.subr.bf16.mxu1 %v5700_v7 }
 0x12a   :  { %v3891_v58 = vpack.c.bf16 %v5706_v27, %v5705_v18  ;;  %v5713_v18 = vld [vmem:[#allocation12_spill] sm:$0xff] }
 0x12b   :  { %3846 = vmatpush3.bf16.msra.mxu0 %v3845_v14 }
 0x12c   :  { %3870 = vmatpush3.bf16.msra.mxu1 %v5701_v59  ;;  %3848 = vmatprep.subr.bf16.mxu0 %v3847_v54 }
 0x12d   :  { %3872 = vmatprep.subr.bf16.mxu1 %v5702_v61  ;;  %v2781_v51 = vpop.f32.mrb[0].mxu0 }
 0x12e   :  { %v2782_v20 = vpop.f32.mrb[1].mxu0 }
 0x12f   :  { %3850 = vmatpush3.bf16.msra.mxu0 %v3849_v10  ;;  %v2783_v8 = vadd.f32 %v2782_v20, %v2781_v51  ;;  %v5707_v10 = vand.u32 4294901760, %v4933_v46  ;;  %v5711_v46 = vand.u32 4294901760, %v4977_v0  ;;  %v5717_v0 = vand.u32 4294901760, %v5019_v29 }
 0x130   :  { %3874 = vmatpush3.bf16.msra.mxu1 %v5703_v37  ;;  %3852 = vmatprep.subr.bf16.mxu0 %v3851_v30  ;;  %v5708_v30 = vand.u32 4294901760, %v4935_v4  ;;  %v5712_v4 = vand.u32 4294901760, %v4979_v12  ;;  %v5718_v12 = vand.u32 4294901760, %v5026_v24  ;;  %v5722_v29 = vand.u32 4294901760, %v5073_v47 }
 0x131   :  { %3876 = vmatprep.subr.bf16.mxu1 %v5704_v19  ;;  %v5723_v24 = vand.u32 4294901760, %v5084_v3  ;;  %v5727_v47 = vand.u32 4294901760, %v5699_v5  ;;  %v5728_v3 = vand.u32 4294901760, %v5126_v28  ;;  %v5733_v28 = vand.u32 4294901760, %v5194_v39 }
 0x132   :  { %v3893_v51 = vpack.c.bf16 %v5708_v30, %v5707_v10 }
 0x133   :  { %3854 = vmatpush3.bf16.msra.mxu0 %v3853_v42  ;;  %v5709_v42 = vand.u32 4294901760, %v4958_v36  ;;  %v5714_v36 = vand.u32 4294901760, %v4995_v52  ;;  %v5720_v52 = vand.u32 4294901760, %v5049_v53 }
 0x134   :  { %3878 = vmatpush3.bf16.msra.mxu1 %v5100_v60  ;;  %3856 = vmatprep.subr.bf16.mxu0 %v3855_v48 }
 0x135   :  { %3880 = vmatprep.subr.bf16.mxu1 %v5114_v44  ;;  %v3895_v33 = vpack.c.bf16 %v5710_v57, %v5709_v42  ;;  %v3899_v27 = vpack.c.bf16 %v5715_v38, %v5714_v36 }
 0x136   :  { %v2816_v14 = vpop.f32.mrb[0].mxu1 }
 0x137   :  { %v2817_v54 = vpop.f32.mrb[1].mxu1  ;;  %3858 = vmatpush3.bf16.msra.mxu0 %v3857_v26  ;;  %v3897_v26 = vpack.c.bf16 %v5712_v4, %v5711_v46 }
 0x138   :  { %v2818_v20 = vadd.f32 %v2817_v54, %v2816_v14  ;;  %3882 = vmatpush3.bf16.msra.mxu1 %v5131_v56  ;;  %3892 = vmatprep.subr.bf16.mxu0 %v3891_v58  ;;  %v5719_v14 = vand.u32 4294901760, %v5029_v43  ;;  %v3907_v43 = vpack.c.bf16 %v5723_v24, %v5722_v29 }
 0x139   :  { %3884 = vmatprep.subr.bf16.mxu1 %v5156_v22 }
 0x13a   :  { %v481_v48 = vadd.f32 %v2818_v20, %v2783_v8  ;;  %2341 = vmatmul.mubr.f32.vlgmr.msra.gmra.mrb[14].mxu0 %v5208_v11  ;;  %v5716_v8 = vand.u32 4294901760, %v5010_v35  ;;  %v3903_v54 = vpack.c.bf16 %v5719_v14, %v5718_v12  ;;  %v3905_v35 = vpack.c.bf16 %v5721_v16, %v5720_v52 }
 0x13b   :  { %3894 = vmatpush3.bf16.msra.mxu0 %v3893_v51  ;;  %2615 = vmatprep.mubr.f32.mxu0 %v5713_v18  ;;  %v5725_v11 = vand.u32 4294901760, %v5112_v9  ;;  %v5731_v9 = vand.u32 4294901760, %v5160_v6  ;;  %v5737_v51 = vand.u32 4294901760, %v5223_v1 }
 0x13c   :  { %3886 = vmatpush3.bf16.msra.mxu1 %v5235_v40  ;;  %3896 = vmatprep.subr.bf16.mxu0 %v3895_v33  ;;  %v3901_v58 = vpack.c.bf16 %v5717_v0, %v5716_v8 }
 0x13d   :  { %3888 = vmatprep.subr.bf16.mxu1 %v5237_v62 }
 0x13f   :  { %3898 = vmatpush3.bf16.msra.mxu0 %v3897_v26 }
 0x140   :  { %3890 = vmatpush3.bf16.msra.mxu1 %v5260_v55  ;;  %3900 = vmatprep.subr.bf16.mxu0 %v3899_v27 }
 0x141   :  { %3924 = vmatprep.subr.bf16.mxu1 %v4962_v2  ;;  %v5724_v2 = vand.u32 4294901760, %v5090_v21  ;;  %v5730_v21 = vand.u32 4294901760, %v5158_v31  ;;  %v5735_v31 = vand.u32 4294901760, %v5203_v13 }
 0x143   :  { %2449 = vmatmul.mubr.f32.vlgmr.msra.gmra.mrb[14].mxu1 %v1968_v32  ;;  %3902 = vmatpush3.bf16.msra.mxu0 %v3901_v58  ;;  %v3909_v53 = vpack.c.bf16 %v5725_v11, %v5724_v2  ;;  %v3911_v32 = vpack.c.bf16 %v5727_v47, %v5726_v45 }
 0x144   :  { %3926 = vmatpush3.bf16.msra.mxu1 %v5694_v63  ;;  %3904 = vmatprep.subr.bf16.mxu0 %v3903_v54  ;;  %v5729_v63 = vand.u32 4294901760, %v5138_v34 }
 0x145   :  { %3928 = vmatprep.subr.bf16.mxu1 %v5695_v25  ;;  %2719 = vmatprep.mubr.f32.mxu1 %v5713_v18 }
 0x146   :  { %v3913_v25 = vpack.c.bf16 %v5729_v63, %v5728_v3 }
 0x147   :  { %3906 = vmatpush3.bf16.msra.mxu0 %v3905_v35 }
 0x148   :  { %3930 = vmatpush3.bf16.msra.mxu1 %v5697_v50  ;;  %3908 = vmatprep.subr.bf16.mxu0 %v3907_v43  ;;  %v3915_v50 = vpack.c.bf16 %v5731_v9, %v5730_v21 }
 0x149   :  { %3932 = vmatprep.subr.bf16.mxu1 %v5700_v7  ;;  %v5732_v7 = vand.u32 4294901760, %v5191_v49 }
 0x14b   :  { %3910 = vmatpush3.bf16.msra.mxu0 %v3909_v53  ;;  %v3917_v34 = vpack.c.bf16 %v5733_v28, %v5732_v7 }
 0x14c   :  { %3934 = vmatpush3.bf16.msra.mxu1 %v5701_v59  ;;  %3912 = vmatprep.subr.bf16.mxu0 %v3911_v32  ;;  %v5734_v59 = vand.u32 4294901760, %v5200_v23 }
 0x14d   :  { %v2851_v41 = vpop.f32.mrb[2].mxu0  ;;  %3936 = vmatprep.subr.bf16.mxu1 %v5702_v61  ;;  %v5736_v61 = vand.u32 4294901760, %v5220_v17 }
 0x14e   :  { %v2852_v5 = vpop.f32.mrb[3].mxu0  ;;  %v3919_v6 = vpack.c.bf16 %v5735_v31, %v5734_v59 }
 0x14f   :  { %v2853_v10 = vadd.f32 %v2852_v5, %v2851_v41  ;;  %3914 = vmatpush3.bf16.msra.mxu0 %v3913_v25  ;;  %v3921_v49 = vpack.c.bf16 %v5737_v51, %v5736_v61 }
 0x150   :  { %3938 = vmatpush3.bf16.msra.mxu1 %v5703_v37  ;;  %3916 = vmatprep.subr.bf16.mxu0 %v3915_v50 }
 0x151   :  { %v619_v30 = vadd.f32 %v2853_v10, %v481_v48  ;;  %3940 = vmatprep.subr.bf16.mxu1 %v5704_v19 }
 0x153   :  { %3918 = vmatpush3.bf16.msra.mxu0 %v3917_v34 }
 0x154   :  { %3942 = vmatpush3.bf16.msra.mxu1 %v5100_v60  ;;  %3920 = vmatprep.subr.bf16.mxu0 %v3919_v6 }
 0x155   :  { %3944 = vmatprep.subr.bf16.mxu1 %v5114_v44 }
 0x156   :  { %v2886_v39 = vpop.f32.mrb[2].mxu1 }
 0x157   :  { %v2887_v37 = vpop.f32.mrb[3].mxu1  ;;  %3922 = vmatpush3.bf16.msra.mxu0 %v3921_v49 }
 0x158   :  { %v2888_v23 = vadd.f32 %v2887_v37, %v2886_v39  ;;  %3946 = vmatpush3.bf16.msra.mxu1 %v5131_v56 }
 0x159   :  { %3948 = vmatprep.subr.bf16.mxu1 %v5156_v22 }
 0x15a   :  { %v727_v13 = vadd.f32 %v2888_v23, %v619_v30  ;;  %2617 = vmatmul.mubr.f32.vlgmr.msra.gmra.mrb[16].mxu0 %v5177_v15 }
 0x15c   :  { %3950 = vmatpush3.bf16.msra.mxu1 %v5235_v40 }
 0x15d   :  { %3952 = vmatprep.subr.bf16.mxu1 %v5237_v62 }
 0x160   :  { %3954 = vmatpush3.bf16.msra.mxu1 %v5260_v55 }
 0x163   :  { %2721 = vmatmul.mubr.f32.vlgmr.msra.gmra.mrb[16].mxu1 %v5177_v15 }
 0x16d   :  { %v2921_v60 = vpop.f32.mrb[4].mxu0 }
 0x16e   :  { %v2922_v44 = vpop.f32.mrb[5].mxu0 }
 0x16f   :  { %v2923_v17 = vadd.f32 %v2922_v44, %v2921_v60 }
 0x171   :  { %v895_v1 = vadd.f32 %v2923_v17, %v727_v13 }
 0x176   :  { %v2956_v19 = vpop.f32.mrb[4].mxu1 }
 0x177   :  { %v2957_v20 = vpop.f32.mrb[5].mxu1 }
 0x178   :  { %v2958_v56 = vadd.f32 %v2957_v20, %v2956_v19 }
 0x17a   :  { %v999_v42 = vadd.f32 %v2958_v56, %v895_v1 }
 0x18d   :  { %v2991_v22 = vpop.f32.mrb[6].mxu0 }
 0x18e   :  { %v2992_v57 = vpop.f32.mrb[7].mxu0 }
 0x18f   :  { %v2993_v33 = vadd.f32 %v2992_v57, %v2991_v22 }
 0x191   :  { %v1111_v48 = vadd.f32 %v2993_v33, %v999_v42 }
 0x196   :  { %v3026_v46 = vpop.f32.mrb[6].mxu1 }
 0x197   :  { %v3027_v40 = vpop.f32.mrb[7].mxu1 }
 0x198   :  { %v3028_v4 = vadd.f32 %v3027_v40, %v3026_v46 }
 0x19a   :  { %v1343_v62 = vadd.f32 %v3028_v4, %v1111_v48 }
 0x1ad   :  { %v3061_v26 = vpop.f32.mrb[8].mxu0 }
 0x1ae   :  { %v3062_v55 = vpop.f32.mrb[9].mxu0 }
 0x1af   :  { %v3063_v18 = vadd.f32 %v3062_v55, %v3061_v26 }
 0x1b1   :  { %v1481_v15 = vadd.f32 %v3063_v18, %v1343_v62 }
 0x1b6   :  { %v3096_v36 = vpop.f32.mrb[8].mxu1 }
 0x1b7   :  { %v3097_v38 = vpop.f32.mrb[9].mxu1 }
 0x1b8   :  { %v3098_v27 = vadd.f32 %v3097_v38, %v3096_v36 }
 0x1ba   :  { %v1589_v8 = vadd.f32 %v3098_v27, %v1481_v15 }
 0x1cd   :  { %v3131_v0 = vpop.f32.mrb[10].mxu0 }
 0x1ce   :  { %v3132_v58 = vpop.f32.mrb[11].mxu0 }
 0x1cf   :  { %v3133_v12 = vadd.f32 %v3132_v58, %v3131_v0 }
 0x1d1   :  { %v1757_v14 = vadd.f32 %v3133_v12, %v1589_v8 }
 0x1d6   :  { %v3166_v54 = vpop.f32.mrb[10].mxu1 }
 0x1d7   :  { %v3167_v52 = vpop.f32.mrb[11].mxu1 }
 0x1d8   :  { %v3168_v16 = vadd.f32 %v3167_v52, %v3166_v54 }
 0x1da   :  { %v1861_v35 = vadd.f32 %v3168_v16, %v1757_v14 }
 0x1ed   :  { %v3201_v29 = vpop.f32.mrb[12].mxu0 }
 0x1ee   :  { %v3202_v24 = vpop.f32.mrb[13].mxu0 }
 0x1ef   :  { %v3203_v43 = vadd.f32 %v3202_v24, %v3201_v29 }
 0x1f1   :  { %v1973_v2 = vadd.f32 %v3203_v43, %v1861_v35 }
 0x1f6   :  { %v3236_v11 = vpop.f32.mrb[12].mxu1 }
 0x1f7   :  { %v3237_v53 = vpop.f32.mrb[13].mxu1 }
 0x1f8   :  { %v3238_v45 = vadd.f32 %v3237_v53, %v3236_v11 }
 0x1fa   :  { %v2205_v47 = vadd.f32 %v3238_v45, %v1973_v2 }
 0x20d   :  { %v3271_v32 = vpop.f32.mrb[14].mxu0 }
 0x20e   :  { %v3272_v3 = vpop.f32.mrb[15].mxu0 }
 0x20f   :  { %v3273_v63 = vadd.f32 %v3272_v3, %v3271_v32 }
 0x211   :  { %v2343_v25 = vadd.f32 %v3273_v63, %v2205_v47 }
 0x216   :  { %v3306_v21 = vpop.f32.mrb[14].mxu1 }
 0x217   :  { %v3307_v9 = vpop.f32.mrb[15].mxu1 }
 0x218   :  { %v3308_v50 = vadd.f32 %v3307_v9, %v3306_v21 }
 0x21a   :  { %v2451_v41 = vadd.f32 %v3308_v50, %v2343_v25 }
 0x22d   :  { %v3341_v5 = vpop.f32.mrb[16].mxu0 }
 0x22e   :  { %v3342_v10 = vpop.f32.mrb[17].mxu0 }
 0x22f   :  { %v3343_v7 = vadd.f32 %v3342_v10, %v3341_v5 }
 0x231   :  { %v2619_v28 = vadd.f32 %v3343_v7, %v2451_v41 }
 0x236   :  { %v3376_v34 = vpop.f32.mrb[16].mxu1 }
 0x237   :  { %v3377_v59 = vpop.f32.mrb[17].mxu1 }
 0x238   :  { %v3378_v31 = vadd.f32 %v3377_v59, %v3376_v34 }
 0x23a   :  { %v2723_v6 = vadd.f32 %v3378_v31, %v2619_v28 }
 0x23c   :  { %v2726_v30 = vmul.f32 %v2723_v6, %v2723_v6 }
 0x23e   :  { %2727 = vadd.xlane.f32.xlu0 %v2726_v30 }
 0x2cb   :  { %v2728_v61 = vpop.xlane.xlu0 %2727 }
 0x2cc   :  { %v2729_v51 = vmax.f32 %v2728_v61, 1e-24 }
 0x2ce   :  { %3960 = vrsqrt.f32 %v2729_v51 }
 0x2d8   :  { %v3961_v49 = vpop.eup %3960 }
 0x2d9   :  { %v2731_v39 = vmul.f32 %v3961_v49, %v2723_v6 }
 0x2db   :  { %2732 = vst [vmem:[#allocation7] sm:$0xff] %v2731_v39 }
 0x2dc   :  { %4017 = shalt.err (!%p4014_p6)
}
 0x2dd   :  { %s4018_s10 = scalar_lea.hbm %s5423_s2, 128 }
 0x2de   :  { %p4019_p7 = scmp.ne.s32.totalorder %s5423_s2, %s4018_s10  ;;  %p4022_p8 = scmp.lt.u32.totalorder %s4018_s10, %s5423_s2 }
 0x2e0   :  { %p4024_p9 = pnand %p4022_p8, %p4019_p7 }
 0x2e2   :  { %4027 = shalt.err (!%p4024_p9)
}
 0x2e3   :  { %2742 = dma.vmem_to_hbm [thread:$0]  %s2740_s6, 128, %s5423_s2, [#allocation4]  }
 0x2e4   :  { %4032 = dma.done.wait [#allocation4], 128  }
 0x2e5   :  { %4033 = vsyncadd [#allocation4], 4294967168 }
 0x2e6   :  { %2746 = vsyncpa [#allocation3], 1 }
 0x2e7   :  { %2747 = vsyncpa [#allocation6], 1 }
 0x2e8   :  { %2748 = vsyncpa [#allocation4], 1 }

</bundles_post_ra>
